<compile_context>
chip_gen: v6e
topology: v6e:2x2x1
jax: 0.10.0
libtpu: 0.0.40
codegen_flags: <defaults>
</compile_context>

<pallas_src>
import functools

import jax
import jax.numpy as jnp
from jax.experimental import pallas as pl
from jax.experimental.pallas import tpu as pltpu


# ---------------------------------------------------------------------------
# Kernel 1: fused (conditional) LayerNorm + linear projection
# ---------------------------------------------------------------------------
def _ln_proj_kernel(flag_ref, x_ref, g_ref, b_ref, w_ref, o_ref, *, eps):
    # flag_ref : SMEM (1,) int32   -- 1: apply LayerNorm, 0: pass input through
    # x_ref    : (bm, C)   g_ref/b_ref : (1, C)   w_ref : (C, Co)   o_ref : (bm, Co)
    x = x_ref[...].astype(jnp.float32)
    mu = jnp.mean(x, axis=-1, keepdims=True)
    xc = x - mu
    var = jnp.mean(xc * xc, axis=-1, keepdims=True)
    xn = xc * jax.lax.rsqrt(var + eps)
    xn = xn * g_ref[...].astype(jnp.float32) + b_ref[...].astype(jnp.float32)

    # Arithmetic blend on a scalar flag (0.0 / 1.0): branch-free select of LN vs raw.
    sel = (flag_ref[0] != 0).astype(jnp.float32)
    xin = x + sel * (xn - x)

    # Feed the MXU in the weight's native dtype (no f32 upcast of operands),
    # accumulate in f32.
    xin = xin.astype(w_ref.dtype)
    o_ref[...] = jnp.dot(xin, w_ref[...],
                         preferred_element_type=jnp.float32).astype(o_ref.dtype)


def _ln_project(x2d, gamma2d, beta2d, w, flag, *, eps, block_m):
    M, C = x2d.shape
    Co = w.shape[1]

    # Keep the M tile large (perf feedback) but keep >= 2 grid steps when possible
    # so the parallel axis can shard across v7x's two TensorCores.
    bm = block_m
    while bm > 128 and (M + bm - 1) // bm < 2:
        bm //= 2

    Mp = ((M + bm - 1) // bm) * bm
    if Mp != M:
        x2d = jnp.pad(x2d, ((0, Mp - M), (0, 0)))

    out = pl.pallas_call(
        functools.partial(_ln_proj_kernel, eps=eps),
        out_shape=jax.ShapeDtypeStruct((Mp, Co), x2d.dtype),
        grid_spec=pltpu.PrefetchScalarGridSpec(
            num_scalar_prefetch=1,                      # the LN-enable flag -> SMEM
            grid=(Mp // bm,),
            in_specs=[
                pl.BlockSpec((bm, C), lambda i, flag: (i, 0)),   # activation tile
                pl.BlockSpec((1, C), lambda i, flag: (0, 0)),    # LN gamma (resident)
                pl.BlockSpec((1, C), lambda i, flag: (0, 0)),    # LN beta  (resident)
                pl.BlockSpec((C, Co), lambda i, flag: (0, 0)),   # weight   (resident)
            ],
            out_specs=pl.BlockSpec((bm, Co), lambda i, flag: (i, 0)),
        ),
        compiler_params=pltpu.CompilerParams(
            dimension_semantics=("parallel",)),
    )(flag, x2d, gamma2d, beta2d, w)

    return out[:M] if Mp != M else out


# ---------------------------------------------------------------------------
# Kernel 2: attention + fused output projection (head axis = reduction)
# ---------------------------------------------------------------------------
def _attn_proj_kernel(q_ref, k_ref, v_ref, wo_ref, bo_ref, o_ref, acc_ref, *, scale):
    # q_ref : (1,1,bq,D)  k_ref/v_ref : (1,1,N,D)  wo_ref : (1,D,dim)  bo_ref : (1,dim)
    # o_ref : (1,bq,dim)  acc_ref : VMEM (bq, dim) f32, resident across the head axis
    h = pl.program_id(2)

    @pl.when(h == 0)
    def _():
        acc_ref[...] = jnp.zeros_like(acc_ref)

    q = q_ref[0, 0]                       # (bq, D)  native dtype
    k = k_ref[0, 0]                       # (N, D)
    v = v_ref[0, 0]                       # (N, D)

    # scores = q @ k^T * scale, in f32
    s = jax.lax.dot_general(q, k, (((1,), (1,)), ((), ())),
                            preferred_element_type=jnp.float32) * scale
    s = s - jnp.max(s, axis=-1, keepdims=True)
    p = jnp.exp(s)
    p = p / jnp.sum(p, axis=-1, keepdims=True)

    # per-head output, then accumulate this head's slice of the output projection
    o_h = jnp.dot(p.astype(v.dtype), v, preferred_element_type=jnp.float32)     # (bq, D)
    acc_ref[...] += jnp.dot(o_h.astype(wo_ref.dtype), wo_ref[0],
                            preferred_element_type=jnp.float32)                 # (bq, dim)

    @pl.when(h == pl.num_programs(2) - 1)
    def _():
        o_ref[0] = (acc_ref[...] + bo_ref[...].astype(jnp.float32)).astype(o_ref.dtype)


# ---------------------------------------------------------------------------
# Wrapper
# ---------------------------------------------------------------------------
@functools.partial(jax.jit, static_argnames=("heads", "dim_head", "block_m", "block_q"))
def attention_pallas(x, y, z, gamma, beta, wq, wk, wv, wo, bo, *,
                     heads, dim_head, block_m=512, block_q=128):
    """x, y, z: (B, N, dim). Weights stored (in, out) = W.T of the PyTorch Linear."""
    B, N, C = x.shape
    inner = heads * dim_head
    assert wq.shape == (C, inner) and wk.shape == (C, inner) and wv.shape == (C, inner)
    assert wo.shape[0] == inner
    dim_out = wo.shape[1]
    eps = 1e-5
    scale = float(dim_head) ** -0.5

    gamma2d = gamma.reshape(1, C)
    beta2d = beta.reshape(1, C)
    bo2d = bo.reshape(1, dim_out)

    # Replicates `if x.equal(y)`: z is LayerNormed only when x == y elementwise.
    same = jnp.array_equal(x, y)
    flag_on = jnp.ones((1,), jnp.int32)
    flag_z = jnp.reshape(same.astype(jnp.int32), (1,))

    M = B * N
    q2d = _ln_project(x.reshape(M, C), gamma2d, beta2d, wq, flag_on, eps=eps, block_m=block_m)
    k2d = _ln_project(y.reshape(M, C), gamma2d, beta2d, wk, flag_on, eps=eps, block_m=block_m)
    v2d = _ln_project(z.reshape(M, C), gamma2d, beta2d, wv, flag_z, eps=eps, block_m=block_m)

    # rearrange 'b n (h d) -> b h n d'
    def split_heads(t2d):
        return t2d.reshape(B, N, heads, dim_head).transpose(0, 2, 1, 3)

    q = split_heads(q2d)
    k = split_heads(k2d)
    v = split_heads(v2d)
    wo3 = wo.reshape(heads, dim_head, dim_out)   # head h owns rows [h*D:(h+1)*D] of Wo

    bq = min(block_q, N)
    assert N % bq == 0  # TODO(synk): pad/mask ragged sequence lengths
    # TODO(synk): for long sequences, tile the key/value axis with an online-softmax
    # (flash) reduction instead of holding full (N, D) K/V blocks in VMEM.

    out = pl.pallas_call(
        functools.partial(_attn_proj_kernel, scale=scale),
        out_shape=jax.ShapeDtypeStruct((B, N, dim_out), x.dtype),
        grid_spec=pltpu.PrefetchScalarGridSpec(
            num_scalar_prefetch=0,
            grid=(B, N // bq, heads),            # heads = innermost reduction axis
            in_specs=[
                pl.BlockSpec((1, 1, bq, dim_head), lambda b, qi, h: (b, h, qi, 0)),  # q
                pl.BlockSpec((1, 1, N, dim_head), lambda b, qi, h: (b, h, 0, 0)),    # k
                pl.BlockSpec((1, 1, N, dim_head), lambda b, qi, h: (b, h, 0, 0)),    # v
                pl.BlockSpec((1, dim_head, dim_out), lambda b, qi, h: (h, 0, 0)),    # Wo[h]
                pl.BlockSpec((1, dim_out), lambda b, qi, h: (0, 0)),                 # bo
            ],
            out_specs=pl.BlockSpec((1, bq, dim_out), lambda b, qi, h: (b, qi, 0)),
            scratch_shapes=[pltpu.VMEM((bq, dim_out), jnp.float32)],
        ),
        compiler_params=pltpu.CompilerParams(
            dimension_semantics=("parallel", "parallel", "arbitrary")),
    )(q, k, v, wo3, bo2d)
    return out


# ---------------------------------------------------------------------------
# Pure-JAX reference
# ---------------------------------------------------------------------------
def _reference_attention(x, y, z, gamma, beta, wq, wk, wv, wo, bo, heads, dim_head):
    eps = 1e-5

    def ln(t):
        mu = jnp.mean(t, -1, keepdims=True)
        var = jnp.mean((t - mu) ** 2, -1, keepdims=True)
        return (t - mu) / jnp.sqrt(var + eps) * gamma + beta

    same = jnp.array_equal(x, y)
    xn, yn = ln(x), ln(y)
    zn = jnp.where(same, ln(z), z)
    q, k, v = xn @ wq, yn @ wk, zn @ wv

    B, N, _ = x.shape

    def split(t):
        return t.reshape(B, N, heads, dim_head).transpose(0, 2, 1, 3)

    qh, kh, vh = split(q), split(k), split(v)
    s = jnp.einsum("bhqd,bhkd->bhqk", qh, kh) * (float(dim_head) ** -0.5)
    p = jax.nn.softmax(s, axis=-1)
    o = jnp.einsum("bhqk,bhkd->bhqd", p, vh)
    o = o.transpose(0, 2, 1, 3).reshape(B, N, heads * dim_head)
    return o @ wo + bo


if __name__ == "__main__":
    # Small shapes consistent with the module (kept to 128-multiples so every
    # load/store is lane-dense and MXU contractions are well fed).
    B, N, dim = 2, 128, 128
    heads, dim_head = 2, 128          # inner_dim = 256, project_out = True
    inner = heads * dim_head

    key = jax.random.PRNGKey(0)
    keys = jax.random.split(key, 10)
    x = jax.random.normal(keys[0], (B, N, dim), jnp.float32)
    z = jax.random.normal(keys[1], (B, N, dim), jnp.float32)
    y_other = jax.random.normal(keys[2], (B, N, dim), jnp.float32)

    gamma = 1.0 + 0.1 * jax.random.normal(keys[3], (dim,), jnp.float32)
    beta = 0.1 * jax.random.normal(keys[4], (dim,), jnp.float32)
    wq = jax.random.normal(keys[5], (dim, inner), jnp.float32) * dim ** -0.5
    wk = jax.random.normal(keys[6], (dim, inner), jnp.float32) * dim ** -0.5
    wv = jax.random.normal(keys[7], (dim, inner), jnp.float32) * dim ** -0.5
    wo = jax.random.normal(keys[8], (inner, dim), jnp.float32) * inner ** -0.5
    bo = jax.random.normal(keys[9], (dim,), jnp.float32) * 0.05

    run = functools.partial(attention_pallas, heads=heads, dim_head=dim_head)

    # Case A: x == y  ->  the module's `if` branch; z is LayerNormed too.
    out_a = jax.block_until_ready(run(x, x, z, gamma, beta, wq, wk, wv, wo, bo))
    ref_a = _reference_attention(x, x, z, gamma, beta, wq, wk, wv, wo, bo, heads, dim_head)
    assert out_a.shape == (B, N, dim)
    assert jnp.allclose(out_a, ref_a, atol=5e-3, rtol=5e-3), \
        f"case A mismatch, max abs err = {float(jnp.max(jnp.abs(out_a - ref_a)))}"

    # Case B: x != y  ->  z is fed to to_v without LayerNorm.
    out_b = jax.block_until_ready(run(x, y_other, z, gamma, beta, wq, wk, wv, wo, bo))
    ref_b = _reference_attention(x, y_other, z, gamma, beta, wq, wk, wv, wo, bo,
                                 heads, dim_head)
    assert jnp.allclose(out_b, ref_b, atol=5e-3, rtol=5e-3), \
        f"case B mismatch, max abs err = {float(jnp.max(jnp.abs(out_b - ref_b)))}"

    print("KERNEL_OK")
</pallas_src>

<mosaic_0001>
module attributes {stable_mosaic.version = 11 : i64} {
  func.func @_ln_proj_kernel(%arg0: i32, %arg1: memref<1xi32, #tpu.memory_space<smem>>, %arg2: memref<128x128xf32, #tpu.memory_space<vmem>>, %arg3: memref<1x128xf32, #tpu.memory_space<vmem>>, %arg4: memref<1x128xf32, #tpu.memory_space<vmem>>, %arg5: memref<128x256xf32, #tpu.memory_space<vmem>>, %arg6: memref<128x256xf32, #tpu.memory_space<vmem>>) attributes {dimension_semantics = [#tpu.dimension_semantics<parallel>], iteration_bounds = array<i64: 2>, scalar_prefetch = 1 : i64, scratch_operands = 0 : i64, tpu.core_type = #tpu.core_type<tc>, window_params = [{transform_indices = @transform_0, window_bounds = array<i64: 128, 128>}, {pipeline_mode = #tpu.pipeline_mode<synchronous>, transform_indices = @transform_1, window_bounds = array<i64: 1, 128>}, {pipeline_mode = #tpu.pipeline_mode<synchronous>, transform_indices = @transform_2, window_bounds = array<i64: 1, 128>}, {pipeline_mode = #tpu.pipeline_mode<synchronous>, transform_indices = @transform_3, window_bounds = array<i64: 128, 256>}, {transform_indices = @transform_4, window_bounds = array<i64: 128, 256>}]} {
    %c0 = arith.constant 0 : index
    %c0_0 = arith.constant 0 : index
    %0 = vector.load %arg2[%c0, %c0_0] : memref<128x128xf32, #tpu.memory_space<vmem>>, vector<128x128xf32>
    %cst = arith.constant dense<0.000000e+00> : vector<128xf32>
    %1 = vector.multi_reduction <add>, %0, %cst [1] : vector<128x128xf32> to vector<128xf32>
    %2 = vector.shape_cast %1 : vector<128xf32> to vector<128x1xf32>
    %cst_1 = arith.constant 1.280000e+02 : f32
    %3 = vector.broadcast %cst_1 : f32 to vector<128x1xf32>
    %4 = arith.divf %2, %3 : vector<128x1xf32>
    %5 = vector.broadcast %4 : vector<128x1xf32> to vector<128x128xf32>
    %6 = arith.subf %0, %5 : vector<128x128xf32>
    %7 = arith.mulf %6, %6 : vector<128x128xf32>
    %cst_2 = arith.constant dense<0.000000e+00> : vector<128xf32>
    %8 = vector.multi_reduction <add>, %7, %cst_2 [1] : vector<128x128xf32> to vector<128xf32>
    %9 = vector.shape_cast %8 : vector<128xf32> to vector<128x1xf32>
    %cst_3 = arith.constant 1.280000e+02 : f32
    %10 = vector.broadcast %cst_3 : f32 to vector<128x1xf32>
    %11 = arith.divf %9, %10 : vector<128x1xf32>
    %cst_4 = arith.constant 9.99999974E-6 : f32
    %12 = vector.broadcast %cst_4 : f32 to vector<128x1xf32>
    %13 = arith.addf %11, %12 : vector<128x1xf32>
    %14 = math.rsqrt %13 : vector<128x1xf32>
    %15 = vector.broadcast %14 : vector<128x1xf32> to vector<128x128xf32>
    %16 = arith.mulf %6, %15 : vector<128x128xf32>
    %c0_5 = arith.constant 0 : index
    %c0_6 = arith.constant 0 : index
    %17 = vector.load %arg3[%c0_5, %c0_6] : memref<1x128xf32, #tpu.memory_space<vmem>>, vector<1x128xf32>
    %18 = vector.broadcast %17 : vector<1x128xf32> to vector<128x128xf32>
    %19 = arith.mulf %16, %18 : vector<128x128xf32>
    %c0_7 = arith.constant 0 : index
    %c0_8 = arith.constant 0 : index
    %20 = vector.load %arg4[%c0_7, %c0_8] : memref<1x128xf32, #tpu.memory_space<vmem>>, vector<1x128xf32>
    %21 = vector.broadcast %20 : vector<1x128xf32> to vector<128x128xf32>
    %22 = arith.addf %19, %21 : vector<128x128xf32>
    %c0_9 = arith.constant 0 : index
    %23 = memref.load %arg1[%c0_9] : memref<1xi32, #tpu.memory_space<smem>>
    %c0_i32 = arith.constant 0 : i32
    %24 = arith.cmpi ne, %23, %c0_i32 : i32
    %25 = arith.extui %24 : i1 to i32
    %26 = arith.sitofp %25 : i32 to f32
    %27 = arith.subf %22, %0 : vector<128x128xf32>
    %28 = vector.broadcast %26 : f32 to vector<128x128xf32>
    %29 = arith.mulf %28, %27 : vector<128x128xf32>
    %30 = arith.addf %0, %29 : vector<128x128xf32>
    %c0_10 = arith.constant 0 : index
    %c0_11 = arith.constant 0 : index
    %31 = vector.load %arg5[%c0_10, %c0_11] : memref<128x256xf32, #tpu.memory_space<vmem>>, vector<128x256xf32>
    %cst_12 = arith.constant dense<0.000000e+00> : vector<128x256xf32>
    %32 = tpu.matmul %30, %31, %cst_12 {dimension_numbers = #tpu.dot_dimension_numbers<[1], [0], [0], [1], [0, 0, 1, 1], [], []>} : vector<128x128xf32>, vector<128x256xf32>, vector<128x256xf32> -> vector<128x256xf32>
    %c0_13 = arith.constant 0 : index
    %c0_14 = arith.constant 0 : index
    %33 = vector.load %arg6[%c0_13, %c0_14] : memref<128x256xf32, #tpu.memory_space<vmem>>, vector<128x256xf32>
    tpu.vector_store %arg6[%c0_13, %c0_14], %32 {strides = array<i32>} : memref<128x256xf32, #tpu.memory_space<vmem>>, vector<128x256xf32>,
    return
  }
  func.func @transform_0(%arg0: i32, %arg1: memref<1xi32, #tpu.memory_space<smem>>) -> (i32, i32) {
    %c0_i32 = arith.constant 0 : i32
    %c0_i32_0 = arith.constant 0 : i32
    return %arg0, %c0_i32 : i32, i32
  }
  func.func @transform_1(%arg0: i32, %arg1: memref<1xi32, #tpu.memory_space<smem>>) -> (i32, i32) {
    %c0_i32 = arith.constant 0 : i32
    %c0_i32_0 = arith.constant 0 : i32
    %c0_i32_1 = arith.constant 0 : i32
    return %c0_i32, %c0_i32_0 : i32, i32
  }
  func.func @transform_2(%arg0: i32, %arg1: memref<1xi32, #tpu.memory_space<smem>>) -> (i32, i32) {
    %c0_i32 = arith.constant 0 : i32
    %c0_i32_0 = arith.constant 0 : i32
    %c0_i32_1 = arith.constant 0 : i32
    return %c0_i32, %c0_i32_0 : i32, i32
  }
  func.func @transform_3(%arg0: i32, %arg1: memref<1xi32, #tpu.memory_space<smem>>) -> (i32, i32) {
    %c0_i32 = arith.constant 0 : i32
    %c0_i32_0 = arith.constant 0 : i32
    %c0_i32_1 = arith.constant 0 : i32
    return %c0_i32, %c0_i32_0 : i32, i32
  }
  func.func @transform_4(%arg0: i32, %arg1: memref<1xi32, #tpu.memory_space<smem>>) -> (i32, i32) {
    %c0_i32 = arith.constant 0 : i32
    %c0_i32_0 = arith.constant 0 : i32
    return %arg0, %c0_i32 : i32, i32
  }
}

module attributes {stable_mosaic.version = 11 : i64} {
  func.func @_attn_proj_kernel(%arg0: i32, %arg1: i32, %arg2: i32, %arg3: memref<1x1x128x128xf32, #tpu.memory_space<vmem>>, %arg4: memref<1x1x128x128xf32, #tpu.memory_space<vmem>>, %arg5: memref<1x1x128x128xf32, #tpu.memory_space<vmem>>, %arg6: memref<1x128x128xf32, #tpu.memory_space<vmem>>, %arg7: memref<1x128xf32, #tpu.memory_space<vmem>>, %arg8: memref<1x128x128xf32, #tpu.memory_space<vmem>>, %arg9: memref<128x128xf32, #tpu.memory_space<vmem>>) attributes {dimension_semantics = [#tpu.dimension_semantics<parallel>, #tpu.dimension_semantics<parallel>, #tpu.dimension_semantics<arbitrary>], iteration_bounds = array<i64: 2, 1, 2>, scalar_prefetch = 0 : i64, scratch_operands = 1 : i64, tpu.core_type = #tpu.core_type<tc>, window_params = [{transform_indices = @transform_0, window_bounds = array<i64: 1, 1, 128, 128>}, {transform_indices = @transform_1, window_bounds = array<i64: 1, 1, 128, 128>}, {transform_indices = @transform_2, window_bounds = array<i64: 1, 1, 128, 128>}, {transform_indices = @transform_3, window_bounds = array<i64: 1, 128, 128>}, {pipeline_mode = #tpu.pipeline_mode<synchronous>, transform_indices = @transform_4, window_bounds = array<i64: 1, 128>}, {transform_indices = @transform_5, window_bounds = array<i64: 1, 128, 128>}]} {
    %c0_i32 = arith.constant 0 : i32
    %0 = arith.cmpi eq, %arg2, %c0_i32 : i32
    %1 = arith.extui %0 : i1 to i32
    %c0_i32_0 = arith.constant 0 : i32
    %2 = arith.cmpi ne, %1, %c0_i32_0 : i32
    scf.if %2 {
      %cst_25 = arith.constant 0.000000e+00 : f32
      %31 = vector.broadcast %cst_25 : f32 to vector<128x128xf32>
      %c0_26 = arith.constant 0 : index
      %c0_27 = arith.constant 0 : index
      %32 = vector.load %arg9[%c0_26, %c0_27] : memref<128x128xf32, #tpu.memory_space<vmem>>, vector<128x128xf32>
      tpu.vector_store %arg9[%c0_26, %c0_27], %31 {strides = array<i32>} : memref<128x128xf32, #tpu.memory_space<vmem>>, vector<128x128xf32>,
    } else {
    }
    %c0 = arith.constant 0 : index
    %c0_1 = arith.constant 0 : index
    %c0_2 = arith.constant 0 : index
    %c0_3 = arith.constant 0 : index
    %3 = vector.load %arg3[%c0, %c0_1, %c0_2, %c0_3] : memref<1x1x128x128xf32, #tpu.memory_space<vmem>>, vector<1x1x128x128xf32>
    %4 = vector.shape_cast %3 : vector<1x1x128x128xf32> to vector<128x128xf32>
    %c0_4 = arith.constant 0 : index
    %c0_5 = arith.constant 0 : index
    %c0_6 = arith.constant 0 : index
    %c0_7 = arith.constant 0 : index
    %5 = vector.load %arg4[%c0_4, %c0_5, %c0_6, %c0_7] : memref<1x1x128x128xf32, #tpu.memory_space<vmem>>, vector<1x1x128x128xf32>
    %6 = vector.shape_cast %5 : vector<1x1x128x128xf32> to vector<128x128xf32>
    %c0_8 = arith.constant 0 : index
    %c0_9 = arith.constant 0 : index
    %c0_10 = arith.constant 0 : index
    %c0_11 = arith.constant 0 : index
    %7 = vector.load %arg5[%c0_8, %c0_9, %c0_10, %c0_11] : memref<1x1x128x128xf32, #tpu.memory_space<vmem>>, vector<1x1x128x128xf32>
    %8 = vector.shape_cast %7 : vector<1x1x128x128xf32> to vector<128x128xf32>
    %cst = arith.constant dense<0.000000e+00> : vector<128x128xf32>
    %9 = tpu.matmul %4, %6, %cst {dimension_numbers = #tpu.dot_dimension_numbers<[1], [1], [0], [0], [0, 0, 1, 0], [], []>} : vector<128x128xf32>, vector<128x128xf32>, vector<128x128xf32> -> vector<128x128xf32>
    %cst_12 = arith.constant 0.0883883461 : f32
    %10 = vector.broadcast %cst_12 : f32 to vector<128x128xf32>
    %11 = arith.mulf %9, %10 : vector<128x128xf32>
    %cst_13 = arith.constant dense<0xFF800000> : vector<128xf32>
    %12 = vector.multi_reduction <maximumf>, %11, %cst_13 [1] : vector<128x128xf32> to vector<128xf32>
    %13 = vector.shape_cast %12 : vector<128xf32> to vector<128x1xf32>
    %14 = vector.broadcast %13 : vector<128x1xf32> to vector<128x128xf32>
    %15 = arith.subf %11, %14 : vector<128x128xf32>
    %16 = math.exp %15 : vector<128x128xf32>
    %cst_14 = arith.constant dense<0.000000e+00> : vector<128xf32>
    %17 = vector.multi_reduction <add>, %16, %cst_14 [1] : vector<128x128xf32> to vector<128xf32>
    %18 = vector.shape_cast %17 : vector<128xf32> to vector<128x1xf32>
    %19 = vector.broadcast %18 : vector<128x1xf32> to vector<128x128xf32>
    %20 = arith.divf %16, %19 : vector<128x128xf32>
    %cst_15 = arith.constant dense<0.000000e+00> : vector<128x128xf32>
    %21 = tpu.matmul %20, %8, %cst_15 {dimension_numbers = #tpu.dot_dimension_numbers<[1], [0], [0], [1], [0, 0, 1, 1], [], []>} : vector<128x128xf32>, vector<128x128xf32>, vector<128x128xf32> -> vector<128x128xf32>
    %c0_16 = arith.constant 0 : index
    %c0_17 = arith.constant 0 : index
    %22 = vector.load %arg9[%c0_16, %c0_17] : memref<128x128xf32, #tpu.memory_space<vmem>>, vector<128x128xf32>
    %c0_18 = arith.constant 0 : index
    %c0_19 = arith.constant 0 : index
    %c0_20 = arith.constant 0 : index
    %23 = vector.load %arg6[%c0_18, %c0_19, %c0_20] : memref<1x128x128xf32, #tpu.memory_space<vmem>>, vector<1x128x128xf32>
    %24 = vector.shape_cast %23 : vector<1x128x128xf32> to vector<128x128xf32>
    %cst_21 = arith.constant dense<0.000000e+00> : vector<128x128xf32>
    %25 = tpu.matmul %21, %24, %cst_21 {dimension_numbers = #tpu.dot_dimension_numbers<[1], [0], [0], [1], [0, 0, 1, 1], [], []>} : vector<128x128xf32>, vector<128x128xf32>, vector<128x128xf32> -> vector<128x128xf32>
    %26 = arith.addf %22, %25 : vector<128x128xf32>
    %c0_22 = arith.constant 0 : index
    %c0_23 = arith.constant 0 : index
    %27 = vector.load %arg9[%c0_22, %c0_23] : memref<128x128xf32, #tpu.memory_space<vmem>>, vector<128x128xf32>
    tpu.vector_store %arg9[%c0_22, %c0_23], %26 {strides = array<i32>} : memref<128x128xf32, #tpu.memory_space<vmem>>, vector<128x128xf32>,
    %c1_i32 = arith.constant 1 : i32
    %28 = arith.cmpi eq, %arg2, %c1_i32 : i32
    %29 = arith.extui %28 : i1 to i32
    %c0_i32_24 = arith.constant 0 : i32
    %30 = arith.cmpi ne, %29, %c0_i32_24 : i32
    scf.if %30 {
      %c0_25 = arith.constant 0 : index
      %c0_26 = arith.constant 0 : index
      %31 = vector.load %arg9[%c0_25, %c0_26] : memref<128x128xf32, #tpu.memory_space<vmem>>, vector<128x128xf32>
      %c0_27 = arith.constant 0 : index
      %c0_28 = arith.constant 0 : index
      %32 = vector.load %arg7[%c0_27, %c0_28] : memref<1x128xf32, #tpu.memory_space<vmem>>, vector<1x128xf32>
      %33 = vector.broadcast %32 : vector<1x128xf32> to vector<128x128xf32>
      %34 = arith.addf %31, %33 : vector<128x128xf32>
      %c0_29 = arith.constant 0 : index
      %c0_30 = arith.constant 0 : index
      %c0_31 = arith.constant 0 : index
      %35 = vector.load %arg8[%c0_29, %c0_30, %c0_31] : memref<1x128x128xf32, #tpu.memory_space<vmem>>, vector<1x128x128xf32>
      %36 = vector.shape_cast %35 : vector<1x128x128xf32> to vector<128x128xf32>
      %37 = vector.shape_cast %34 : vector<128x128xf32> to vector<1x128x128xf32>
      tpu.vector_store %arg8[%c0_29, %c0_30, %c0_31], %37 {strides = array<i32>} : memref<1x128x128xf32, #tpu.memory_space<vmem>>, vector<1x128x128xf32>,
    } else {
    }
    return
  }
  func.func @transform_0(%arg0: i32, %arg1: i32, %arg2: i32) -> (i32, i32, i32, i32) {
    %c0_i32 = arith.constant 0 : i32
    %c0_i32_0 = arith.constant 0 : i32
    return %arg0, %arg2, %arg1, %c0_i32 : i32, i32, i32, i32
  }
  func.func @transform_1(%arg0: i32, %arg1: i32, %arg2: i32) -> (i32, i32, i32, i32) {
    %c0_i32 = arith.constant 0 : i32
    %c0_i32_0 = arith.constant 0 : i32
    %c0_i32_1 = arith.constant 0 : i32
    return %arg0, %arg2, %c0_i32, %c0_i32_0 : i32, i32, i32, i32
  }
  func.func @transform_2(%arg0: i32, %arg1: i32, %arg2: i32) -> (i32, i32, i32, i32) {
    %c0_i32 = arith.constant 0 : i32
    %c0_i32_0 = arith.constant 0 : i32
    %c0_i32_1 = arith.constant 0 : i32
    return %arg0, %arg2, %c0_i32, %c0_i32_0 : i32, i32, i32, i32
  }
  func.func @transform_3(%arg0: i32, %arg1: i32, %arg2: i32) -> (i32, i32, i32) {
    %c0_i32 = arith.constant 0 : i32
    %c0_i32_0 = arith.constant 0 : i32
    %c0_i32_1 = arith.constant 0 : i32
    return %arg2, %c0_i32, %c0_i32_0 : i32, i32, i32
  }
  func.func @transform_4(%arg0: i32, %arg1: i32, %arg2: i32) -> (i32, i32) {
    %c0_i32 = arith.constant 0 : i32
    %c0_i32_0 = arith.constant 0 : i32
    %c0_i32_1 = arith.constant 0 : i32
    return %c0_i32, %c0_i32_0 : i32, i32
  }
  func.func @transform_5(%arg0: i32, %arg1: i32, %arg2: i32) -> (i32, i32, i32) {
    %c0_i32 = arith.constant 0 : i32
    %c0_i32_0 = arith.constant 0 : i32
    return %arg0, %arg1, %c0_i32 : i32, i32, i32
  }
}

</mosaic_0001>

<bundles_post_ra>
// kernel: attention_pallas.6
= control target key start
LH: loop header
LB: loop body
LE: loop exit
PB: predicated region body
PF: predicated region fallthrough
CT: control target
= control target key end

     0   :  { %s910_s20 = smov 0   ;;  %s1313_s0 = inlined_call_operand.<no memory space> [shape: s32[1], index: 0, kind: input, shape index: {}]   ;;  %s1314_s1 = inlined_call_operand.vmem [shape: f32[256,128], index: 1, kind: input, shape index: {}]   ;;  %s1315_s2 = inlined_call_operand.vmem [shape: f32[1,128], index: 2, kind: input, shape index: {}]   ;;  %s1316_s3 = inlined_call_operand.vmem [shape: f32[1,128], index: 3, kind: input, shape index: {}]   ;;  %s1317_s4 = inlined_call_operand.vmem [shape: f32[128,256], index: 4, kind: input, shape index: {}]   ;;  %s1318_s5 = inlined_call_operand.vmem [shape: f32[256,256], index: 5, kind: output, shape index: {}]  }
   0x1   :  { %10 = sst [smem:[#allocation3]] %s1313_s0 }
   0x2 LB: > { %s780_s21 = sadd.s32 4294967295, %s874_s20   ;;  %p784_p0 = scmp.ge.s32.totalorder %s874_s20, 1  ;;  %s874_s20 = sphi %s910_s20, %s16_s20  }
   0x3   : > { %p165_p1 = scmp.lt.s32.totalorder %s874_s20, 3 }
   0x5   : > { %p166_p2 = pnand %p784_p0, %p165_p1 }
   0x6   : > { %s785_s22 = sshll.u32 (!%p166_p2), %s780_s21, 4  ;;  %s444_s17 = sld [smem:[#allocation3]] (!%p166_p2) }
   0x7   : > { %169 = sbr.rel (%p166_p2) target bundleno = 558 (0x22e), region = 36  ;;  %p193_p3 = scmp.lt.s32.totalorder (!%p166_p2), %s785_s22, 31 }
   0xc   : > { %s1320_s22 = smov (!%p193_p3, %s785_s22), 31  ;;  %v528_v16 = vld [vmem:[%s1317_s4 + $0xf8] sm:$0xff]  ;;  %v527_v17 = vld [vmem:[%s1317_s4 + $0xf0] sm:$0xff]  ;;  %v526_v50 = vld [vmem:[%s1317_s4 + $0xe8] sm:$0xff]  ;;  %p445_p4 = scmp.ne.s32.totalorder %s444_s17, 0 }
   0xd   : > { %s786_s0 = sshll.u32 %s1320_s22, 3  ;;  %529 = vmatprep.subr.mxu0 %v528_v16  ;;  %795 = vmatprep.subr.mxu1 %v528_v16  ;;  %v525_v54 = vld [vmem:[%s1317_s4 + $0xe0] sm:$0xff]  ;;  %v524_v55 = vld [vmem:[%s1317_s4 + $0xd8] sm:$0xff]  ;;  %v523_v59 = vld [vmem:[%s1317_s4 + $0xd0] sm:$0xff] }
   0xe   : > { %s196_s25 = scalar_lea.vmem %s1314_s1, %s786_s0  ;;  %530 = vmatpush1.msra.mxu0 %v527_v17  ;;  %811 = vmatpush1.msra.mxu1 %v527_v17  ;;  %v522_v17 = vld [vmem:[%s1317_s4 + $0xc8] sm:$0xff] }
   0xf   : > { %v924_v0 = vld [vmem:[%s196_s25] sm:$0xff]  ;;  %v926_v1 = vld [vmem:[%s196_s25 + $0x8] sm:$0xff]  ;;  %v936_v4 = vld [vmem:[%s196_s25 + $0x10] sm:$0xff]  ;;  %531 = vmatprep.subr.mxu0 %v526_v50  ;;  %796 = vmatprep.subr.mxu1 %v526_v50  ;;  %s446_s18 = scalar_select %p445_p4, 1, 0 }
  0x10   : > { %221 = vadd.xlane.f32.xlu0 %v924_v0  ;;  %223 = vadd.xlane.f32.xlu1 %v926_v1  ;;  %v930_v2 = vld [vmem:[%s196_s25 + $0x40] sm:$0xff]  ;;  %v932_v3 = vld [vmem:[%s196_s25 + $0x48] sm:$0xff]  ;;  %v938_v5 = vld [vmem:[%s196_s25 + $0x50] sm:$0xff] }
  0x11   : > { %v942_v6 = vld [vmem:[%s196_s25 + $0x18] sm:$0xff]  ;;  %v948_v8 = vld [vmem:[%s196_s25 + $0x20] sm:$0xff]  ;;  %v954_v10 = vld [vmem:[%s196_s25 + $0x28] sm:$0xff]  ;;  %532 = vmatpush1.msra.mxu0 %v525_v54  ;;  %812 = vmatpush1.msra.mxu1 %v525_v54  ;;  %s447_s24 = scvt.s32.f32 %s446_s18 }
  0x12   : > { %v944_v7 = vld [vmem:[%s196_s25 + $0x58] sm:$0xff]  ;;  %v950_v9 = vld [vmem:[%s196_s25 + $0x60] sm:$0xff]  ;;  %v956_v11 = vld [vmem:[%s196_s25 + $0x68] sm:$0xff]  ;;  %533 = vmatprep.subr.mxu0 %v524_v55  ;;  %797 = vmatprep.subr.mxu1 %v524_v55 }
  0x13   : > { %v960_v12 = vld [vmem:[%s196_s25 + $0x30] sm:$0xff]  ;;  %v966_v14 = vld [vmem:[%s196_s25 + $0x38] sm:$0xff]  ;;  %534 = vmatpush1.msra.mxu0 %v523_v59  ;;  %813 = vmatpush1.msra.mxu1 %v523_v59 }
  0x14   : > { %237 = vadd.xlane.f32.xlu0 %v930_v2  ;;  %239 = vadd.xlane.f32.xlu1 %v932_v3  ;;  %v962_v13 = vld [vmem:[%s196_s25 + $0x70] sm:$0xff]  ;;  %v968_v15 = vld [vmem:[%s196_s25 + $0x78] sm:$0xff]  ;;  %s794_s25 = sshll.u32 %s1320_s22, 4 }
  0x15   : > { %535 = vmatprep.subr.mxu0 %v522_v17  ;;  %798 = vmatprep.subr.mxu1 %v522_v17  ;;  %v512_v55 = vld [vmem:[%s1317_s4 + $0x78] sm:$0xff]  ;;  %v505_v17 = vld [vmem:[%s1317_s4 + $0x40] sm:$0xff]  ;;  %s1276_s28 = scalar_lea.vmem %s1318_s5, %s794_s25 }
  0x18   : > { %225 = vadd.xlane.f32.xlu0 %v936_v4  ;;  %241 = vadd.xlane.f32.xlu1 %v938_v5 }
  0x1c   : > { %227 = vadd.xlane.f32.xlu0 %v942_v6  ;;  %243 = vadd.xlane.f32.xlu1 %v944_v7 }
  0x20   : > { %229 = vadd.xlane.f32.xlu0 %v948_v8  ;;  %245 = vadd.xlane.f32.xlu1 %v950_v9 }
  0x24   : > { %231 = vadd.xlane.f32.xlu0 %v954_v10  ;;  %247 = vadd.xlane.f32.xlu1 %v956_v11 }
  0x28   : > { %233 = vadd.xlane.f32.xlu0 %v960_v12  ;;  %249 = vadd.xlane.f32.xlu1 %v962_v13 }
  0x2c   : > { %235 = vadd.xlane.f32.xlu0 %v966_v14  ;;  %251 = vadd.xlane.f32.xlu1 %v968_v15 }
  0x99   : > { %v222_v18 = vpop.xlane.xlu0 %221  ;;  %v224_v19 = vpop.xlane.xlu1 %223 }
  0x9a   : > { %v254_v20 = vmul.f32 0.0078125, %v222_v18  ;;  %v255_v21 = vmul.f32 0.0078125, %v224_v19  ;;  %v521_v18 = vld [vmem:[%s1317_s4 + $0xc0] sm:$0xff] }
  0x9b   : > { %536 = vmatpush1.msra.mxu0 %v521_v18  ;;  %814 = vmatpush1.msra.mxu1 %v521_v18  ;;  %v504_v18 = vld [vmem:[%s1317_s4 + $0x38] sm:$0xff] }
  0x9c   : > { %v979_v22 = vsub.f32 %v924_v0, %v254_v20  ;;  %v982_v23 = vsub.f32 %v926_v1, %v255_v21 }
  0x9d   : > { %v238_v24 = vpop.xlane.xlu0 %237  ;;  %v240_v25 = vpop.xlane.xlu1 %239 }
  0x9e   : > { %v262_v26 = vmul.f32 0.0078125, %v238_v24  ;;  %v286_v27 = vmul.f32 %v979_v22, %v979_v22  ;;  %v263_v28 = vmul.f32 0.0078125, %v240_v25  ;;  %v287_v31 = vmul.f32 %v982_v23, %v982_v23  ;;  %v520_v24 = vld [vmem:[%s1317_s4 + $0xb8] sm:$0xff] }
  0x9f   : > { %537 = vmatprep.subr.mxu0 %v520_v24  ;;  %799 = vmatprep.subr.mxu1 %v520_v24  ;;  %v502_v24 = vld [vmem:[%s1317_s4 + $0x28] sm:$0xff] }
  0xa0   : > { %v987_v29 = vsub.f32 %v930_v2, %v262_v26  ;;  %302 = vadd.xlane.f32.xlu0 %v286_v27  ;;  %v990_v30 = vsub.f32 %v932_v3, %v263_v28  ;;  %v519_v27 = vld [vmem:[%s1317_s4 + $0xb0] sm:$0xff] }
  0xa1   : > { %v226_v32 = vpop.xlane.xlu0 %225  ;;  %v242_v33 = vpop.xlane.xlu1 %241  ;;  %538 = vmatpush1.msra.mxu0 %v519_v27  ;;  %815 = vmatpush1.msra.mxu1 %v519_v27  ;;  %v499_v27 = vld [vmem:[%s1317_s4 + $0x10] sm:$0xff] }
  0xa2   : > { %v256_v34 = vmul.f32 0.0078125, %v226_v32  ;;  %v294_v35 = vmul.f32 %v987_v29, %v987_v29  ;;  %v264_v36 = vmul.f32 0.0078125, %v242_v33  ;;  %v295_v39 = vmul.f32 %v990_v30, %v990_v30  ;;  %v518_v33 = vld [vmem:[%s1317_s4 + $0xa8] sm:$0xff] }
  0xa3   : > { %539 = vmatprep.subr.mxu0 %v518_v33  ;;  %800 = vmatprep.subr.mxu1 %v518_v33 }
  0xa4   : > { %v997_v37 = vsub.f32 %v936_v4, %v256_v34  ;;  %304 = vadd.xlane.f32.xlu0 %v287_v31  ;;  %318 = vadd.xlane.f32.xlu1 %v294_v35  ;;  %v1000_v38 = vsub.f32 %v938_v5, %v264_v36  ;;  %v517_v34 = vld [vmem:[%s1317_s4 + $0xa0] sm:$0xff] }
  0xa5   : > { %v228_v40 = vpop.xlane.xlu0 %227  ;;  %v244_v41 = vpop.xlane.xlu1 %243  ;;  %540 = vmatpush1.msra.mxu0 %v517_v34  ;;  %816 = vmatpush1.msra.mxu1 %v517_v34 }
  0xa6   : > { %v257_v42 = vmul.f32 0.0078125, %v228_v40  ;;  %v288_v43 = vmul.f32 %v997_v37, %v997_v37  ;;  %v265_v44 = vmul.f32 0.0078125, %v244_v41  ;;  %v296_v47 = vmul.f32 %v1000_v38, %v1000_v38  ;;  %v516_v40 = vld [vmem:[%s1317_s4 + $0x98] sm:$0xff] }
  0xa7   : > { %541 = vmatprep.subr.mxu0 %v516_v40  ;;  %801 = vmatprep.subr.mxu1 %v516_v40 }
  0xa8   : > { %v1007_v45 = vsub.f32 %v942_v6, %v257_v42  ;;  %320 = vadd.xlane.f32.xlu1 %v295_v39  ;;  %306 = vadd.xlane.f32.xlu0 %v288_v43  ;;  %v1010_v46 = vsub.f32 %v944_v7, %v265_v44 }
  0xa9   : > { %v230_v48 = vpop.xlane.xlu0 %229  ;;  %v246_v49 = vpop.xlane.xlu1 %245 }
  0xaa   : > { %v258_v51 = vmul.f32 0.0078125, %v230_v48  ;;  %v289_v52 = vmul.f32 %v1007_v45, %v1007_v45  ;;  %v266_v53 = vmul.f32 0.0078125, %v246_v49  ;;  %v297_v58 = vmul.f32 %v1010_v46, %v1010_v46  ;;  %v515_v48 = vld [vmem:[%s1317_s4 + $0x90] sm:$0xff]  ;;  %v514_v49 = vld [vmem:[%s1317_s4 + $0x88] sm:$0xff] }
  0xab   : > { %542 = vmatpush1.msra.mxu0 %v515_v48  ;;  %817 = vmatpush1.msra.mxu1 %v515_v48 }
  0xac   : > { %v1026_v56 = vsub.f32 %v948_v8, %v258_v51  ;;  %322 = vadd.xlane.f32.xlu1 %v296_v47  ;;  %308 = vadd.xlane.f32.xlu0 %v289_v52  ;;  %v1029_v57 = vsub.f32 %v950_v9, %v266_v53  ;;  %v513_v53 = vld [vmem:[%s1317_s4 + $0x80] sm:$0xff] }
  0xad   : > { %v232_v60 = vpop.xlane.xlu0 %231  ;;  %v248_v61 = vpop.xlane.xlu1 %247  ;;  %543 = vmatprep.subr.mxu0 %v514_v49  ;;  %802 = vmatprep.subr.mxu1 %v514_v49 }
  0xae   : > { %v259_v62 = vmul.f32 0.0078125, %v232_v60  ;;  %v290_v63 = vmul.f32 %v1026_v56, %v1026_v56  ;;  %v267_v16 = vmul.f32 0.0078125, %v248_v61  ;;  %v298_v21 = vmul.f32 %v1029_v57, %v1029_v57  ;;  %544 = vmatpush1.msra.mxu0 %v513_v53  ;;  %818 = vmatpush1.msra.mxu1 %v513_v53  ;;  %v510_v60 = vld [vmem:[%s1317_s4 + $0x68] sm:$0xff]  ;;  %v509_v61 = vld [vmem:[%s1317_s4 + $0x60] sm:$0xff] }
  0xaf   : > { %545 = vmatprep.subr.mxu0 %v512_v55  ;;  %803 = vmatprep.subr.mxu1 %v512_v55 }
  0xb0   : > { %v1045_v19 = vsub.f32 %v954_v10, %v259_v62  ;;  %324 = vadd.xlane.f32.xlu1 %v297_v58  ;;  %310 = vadd.xlane.f32.xlu0 %v290_v63  ;;  %v1048_v20 = vsub.f32 %v956_v11, %v267_v16  ;;  %v511_v58 = vld [vmem:[%s1317_s4 + $0x70] sm:$0xff]  ;;  %v508_v62 = vld [vmem:[%s1317_s4 + $0x58] sm:$0xff]  ;;  %v506_v16 = vld [vmem:[%s1317_s4 + $0x48] sm:$0xff] }
  0xb1   : > { %v234_v25 = vpop.xlane.xlu0 %233  ;;  %v250_v26 = vpop.xlane.xlu1 %249  ;;  %546 = vmatpush1.msra.mxu0 %v511_v58  ;;  %819 = vmatpush1.msra.mxu1 %v511_v58  ;;  %v507_v63 = vld [vmem:[%s1317_s4 + $0x50] sm:$0xff] }
  0xb2   : > { %v260_v28 = vmul.f32 0.0078125, %v234_v25  ;;  %v291_v31 = vmul.f32 %v1045_v19, %v1045_v19  ;;  %v268_v32 = vmul.f32 0.0078125, %v250_v26  ;;  %v299_v39 = vmul.f32 %v1048_v20, %v1048_v20  ;;  %547 = vmatprep.subr.mxu0 %v510_v60  ;;  %804 = vmatprep.subr.mxu1 %v510_v60  ;;  %v501_v25 = vld [vmem:[%s1317_s4 + $0x20] sm:$0xff]  ;;  %v500_v26 = vld [vmem:[%s1317_s4 + $0x18] sm:$0xff] }
  0xb3   : > { %548 = vmatpush1.msra.mxu0 %v509_v61  ;;  %820 = vmatpush1.msra.mxu1 %v509_v61 }
  0xb4   : > { %v1067_v35 = vsub.f32 %v960_v12, %v260_v28  ;;  %326 = vadd.xlane.f32.xlu1 %v298_v21  ;;  %312 = vadd.xlane.f32.xlu0 %v291_v31  ;;  %v1070_v36 = vsub.f32 %v962_v13, %v268_v32  ;;  %v503_v21 = vld [vmem:[%s1317_s4 + $0x30] sm:$0xff]  ;;  %v498_v28 = vld [vmem:[%s1317_s4 + $0x8] sm:$0xff]  ;;  %v497_v31 = vld [vmem:[%s1317_s4] sm:$0xff]  ;;  %v876_v32 = vmov 0.0  }
  0xb5   : > { %v236_v41 = vpop.xlane.xlu0 %235  ;;  %v252_v42 = vpop.xlane.xlu1 %251  ;;  %549 = vmatprep.subr.mxu0 %v508_v62  ;;  %805 = vmatprep.subr.mxu1 %v508_v62 }
  0xb6   : > { %v261_v43 = vmul.f32 0.0078125, %v236_v41  ;;  %v292_v44 = vmul.f32 %v1067_v35, %v1067_v35  ;;  %v269_v47 = vmul.f32 0.0078125, %v252_v42  ;;  %v300_v52 = vmul.f32 %v1070_v36, %v1070_v36  ;;  %550 = vmatpush1.msra.mxu0 %v507_v63  ;;  %821 = vmatpush1.msra.mxu1 %v507_v63 }
  0xb7   : > { %551 = vmatprep.subr.mxu0 %v506_v16  ;;  %806 = vmatprep.subr.mxu1 %v506_v16 }
  0xb8   : > { %v1086_v50 = vsub.f32 %v966_v14, %v261_v43  ;;  %328 = vadd.xlane.f32.xlu1 %v299_v39  ;;  %314 = vadd.xlane.f32.xlu0 %v292_v44  ;;  %v1089_v51 = vsub.f32 %v968_v15, %v269_v47 }
  0xb9   : > { %552 = vmatpush1.msra.mxu0 %v505_v17  ;;  %822 = vmatpush1.msra.mxu1 %v505_v17 }
  0xba   : > { %v293_v54 = vmul.f32 %v1086_v50, %v1086_v50  ;;  %v301_v59 = vmul.f32 %v1089_v51, %v1089_v51  ;;  %553 = vmatprep.subr.mxu0 %v504_v18  ;;  %807 = vmatprep.subr.mxu1 %v504_v18 }
  0xbb   : > { %554 = vmatpush1.msra.mxu0 %v503_v21  ;;  %823 = vmatpush1.msra.mxu1 %v503_v21 }
  0xbc   : > { %330 = vadd.xlane.f32.xlu1 %v300_v52  ;;  %316 = vadd.xlane.f32.xlu0 %v293_v54 }
  0xbd   : > { %555 = vmatprep.subr.mxu0 %v502_v24  ;;  %808 = vmatprep.subr.mxu1 %v502_v24 }
  0xbe   : > { %556 = vmatpush1.msra.mxu0 %v501_v25  ;;  %824 = vmatpush1.msra.mxu1 %v501_v25  ;;  %v1153_v25 = vld [vmem:[%s1315_s2] ss:$0 sm:$0xff] }
  0xbf   : > { %557 = vmatprep.subr.mxu0 %v500_v26  ;;  %593 = vmatprep.mubr.f32.mxu0 %v876_v32 }
  0xc0   : > { %332 = vadd.xlane.f32.xlu1 %v301_v59  ;;  %558 = vmatpush1.msra.mxu0 %v499_v27 }
  0xc1   : > { %559 = vmatprep.subr.mxu0 %v498_v28  ;;  %809 = vmatprep.subr.mxu1 %v500_v26 }
  0xc2   : > { %560 = vmatpush1.msra.mxu0 %v497_v31  ;;  %825 = vmatpush1.msra.mxu1 %v499_v27 }
  0xc3   : > { %810 = vmatprep.subr.mxu1 %v498_v28  ;;  %641 = vmatprep.mubr.f32.mxu1 %v876_v32 }
  0xc4   : > { %826 = vmatpush1.msra.mxu1 %v497_v31 }
 0x129   : > { %v303_v33 = vpop.xlane.xlu0 %302 }
 0x12a   : > { %v334_v34 = vmul.f32 0.0078125, %v303_v33 }
 0x12c   : > { %v350_v39 = vadd.f32 1e-05, %v334_v34  ;;  %v1159_v34 = vld [vmem:[%s1316_s3] ss:$0 sm:$0xff] }
 0x12d   : > { %v319_v40 = vpop.xlane.xlu1 %318  ;;  %v305_v41 = vpop.xlane.xlu0 %304 }
 0x12e   : > { %836 = vrsqrt.f32 %v350_v39  ;;  %v342_v42 = vmul.f32 0.0078125, %v319_v40  ;;  %v335_v43 = vmul.f32 0.0078125, %v305_v41 }
 0x130   : > { %v358_v44 = vadd.f32 1e-05, %v342_v42  ;;  %v351_v47 = vadd.f32 1e-05, %v335_v43 }
 0x131   : > { %v321_v48 = vpop.xlane.xlu1 %320  ;;  %v307_v49 = vpop.xlane.xlu0 %306 }
 0x132   : > { %838 = vrsqrt.f32 %v358_v44  ;;  %v343_v52 = vmul.f32 0.0078125, %v321_v48  ;;  %v336_v53 = vmul.f32 0.0078125, %v307_v49 }
 0x133   : > { %840 = vrsqrt.f32 %v351_v47 }
 0x134   : > { %v359_v54 = vadd.f32 1e-05, %v343_v52  ;;  %v352_v55 = vadd.f32 1e-05, %v336_v53  ;;  %v1164_v53 = vstv %s447_s24 }
 0x135   : > { %v323_v58 = vpop.xlane.xlu1 %322  ;;  %v309_v59 = vpop.xlane.xlu0 %308 }
 0x136   : > { %842 = vrsqrt.f32 %v359_v54  ;;  %v344_v60 = vmul.f32 0.0078125, %v323_v58  ;;  %v337_v61 = vmul.f32 0.0078125, %v309_v59 }
 0x137   : > { %844 = vrsqrt.f32 %v352_v55 }
 0x138   : > { %v360_v62 = vadd.f32 1e-05, %v344_v60  ;;  %v353_v63 = vadd.f32 1e-05, %v337_v61 }
 0x139   : > { %v325_v16 = vpop.xlane.xlu1 %324  ;;  %v311_v17 = vpop.xlane.xlu0 %310 }
 0x13a   : > { %846 = vrsqrt.f32 %v360_v62  ;;  %v345_v18 = vmul.f32 0.0078125, %v325_v16  ;;  %v338_v21 = vmul.f32 0.0078125, %v311_v17 }
 0x13b   : > { %v837_v24 = vpop.eup %836  ;;  %848 = vrsqrt.f32 %v353_v63 }
 0x13c   : > { %v361_v26 = vadd.f32 1e-05, %v345_v18  ;;  %v354_v27 = vadd.f32 1e-05, %v338_v21  ;;  %v382_v28 = vmul.f32 %v837_v24, %v979_v22 }
 0x13d   : > { %v327_v31 = vpop.xlane.xlu1 %326  ;;  %v313_v33 = vpop.xlane.xlu0 %312 }
 0x13e   : > { %850 = vrsqrt.f32 %v361_v26  ;;  %v346_v39 = vmul.f32 0.0078125, %v327_v31  ;;  %v339_v40 = vmul.f32 0.0078125, %v313_v33  ;;  %v405_v41 = vmul.f32 %v1153_v25, %v382_v28 }
 0x13f   : > { %v839_v42 = vpop.eup %838  ;;  %852 = vrsqrt.f32 %v354_v27 }
 0x140   : > { %v841_v43 = vpop.eup %840  ;;  %v362_v44 = vadd.f32 1e-05, %v346_v39  ;;  %v355_v47 = vadd.f32 1e-05, %v339_v40  ;;  %v428_v22 = vadd.f32 %v1159_v34, %v405_v41  ;;  %v390_v48 = vmul.f32 %v839_v42, %v987_v29 }
 0x141   : > { %v329_v49 = vpop.xlane.xlu1 %328  ;;  %v315_v52 = vpop.xlane.xlu0 %314  ;;  %v383_v54 = vmul.f32 %v841_v43, %v982_v23 }
 0x142   : > { %854 = vrsqrt.f32 %v362_v44  ;;  %v347_v55 = vmul.f32 0.0078125, %v329_v49  ;;  %v340_v58 = vmul.f32 0.0078125, %v315_v52  ;;  %v448_v59 = vsub.f32 %v428_v22, %v924_v0 }
 0x143   : > { %v843_v60 = vpop.eup %842  ;;  %856 = vrsqrt.f32 %v355_v47  ;;  %v406_v61 = vmul.f32 %v1153_v25, %v383_v54  ;;  %v413_v62 = vmul.f32 %v1153_v25, %v390_v48 }
 0x144   : > { %v845_v63 = vpop.eup %844  ;;  %v363_v16 = vadd.f32 1e-05, %v347_v55  ;;  %v356_v29 = vadd.f32 1e-05, %v340_v58  ;;  %v465_v17 = vmul.f32 %v1164_v53, %v448_v59  ;;  %v391_v18 = vmul.f32 %v843_v60, %v990_v30 }
 0x145   : > { %v331_v21 = vpop.xlane.xlu1 %330  ;;  %v317_v23 = vpop.xlane.xlu0 %316  ;;  %v429_v24 = vadd.f32 %v1159_v34, %v406_v61  ;;  %v436_v26 = vadd.f32 %v1159_v34, %v413_v62  ;;  %v384_v27 = vmul.f32 %v845_v63, %v997_v37 }
 0x146   : > { %858 = vrsqrt.f32 %v363_v16  ;;  %v348_v28 = vmul.f32 0.0078125, %v331_v21  ;;  %v341_v31 = vmul.f32 0.0078125, %v317_v23  ;;  %v481_v33 = vadd.f32 %v465_v17, %v924_v0 }
 0x147   : > { %v847_v39 = vpop.eup %846  ;;  %860 = vrsqrt.f32 %v356_v29  ;;  %v449_v40 = vsub.f32 %v429_v24, %v926_v1  ;;  %v456_v41 = vsub.f32 %v436_v26, %v930_v2  ;;  %v407_v30 = vmul.f32 %v1153_v25, %v384_v27 }
 0x148   : > { %v849_v42 = vpop.eup %848  ;;  %v364_v43 = vadd.f32 1e-05, %v348_v28  ;;  %v357_v44 = vadd.f32 1e-05, %v341_v31  ;;  %594 = vmatmul.mubr.f32.vlgmr.msra.gmra.mxu0 %v481_v33  ;;  %v414_v47 = vmul.f32 %v1153_v25, %v391_v18  ;;  %v392_v37 = vmul.f32 %v847_v39, %v1000_v38 }
 0x149   : > { %v333_v22 = vpop.xlane.xlu1 %332  ;;  %599 = vmatprep.mubr.f32.mxu0 %v876_v32  ;;  %v466_v0 = vmul.f32 %v1164_v53, %v449_v40  ;;  %v473_v48 = vmul.f32 %v1164_v53, %v456_v41  ;;  %v430_v49 = vadd.f32 %v1159_v34, %v407_v30  ;;  %v385_v52 = vmul.f32 %v849_v42, %v1007_v45 }
 0x14a   : > { %862 = vrsqrt.f32 %v364_v43  ;;  %v349_v54 = vmul.f32 0.0078125, %v333_v22  ;;  %v437_v55 = vadd.f32 %v1159_v34, %v414_v47  ;;  %v415_v58 = vmul.f32 %v1153_v25, %v392_v37 }
 0x14b   : > { %v851_v59 = vpop.eup %850  ;;  %864 = vrsqrt.f32 %v357_v44  ;;  %v482_v38 = vadd.f32 %v466_v0, %v926_v1  ;;  %v489_v60 = vadd.f32 %v473_v48, %v930_v2  ;;  %v450_v61 = vsub.f32 %v430_v49, %v936_v4 }
 0x14c   : > { %v853_v62 = vpop.eup %852  ;;  %v365_v63 = vadd.f32 1e-05, %v349_v54  ;;  %v457_v16 = vsub.f32 %v437_v55, %v932_v3  ;;  %v408_v45 = vmul.f32 %v1153_v25, %v385_v52  ;;  %v438_v29 = vadd.f32 %v1159_v34, %v415_v58 }
 0x14d   : > { %600 = vmatmul.mubr.f32.gmra.mxu0 %v482_v38  ;;  %642 = vmatmul.mubr.f32.vlgmr.msra.gmra.mxu1 %v489_v60  ;;  %v467_v17 = vmul.f32 %v1164_v53, %v450_v61  ;;  %v386_v18 = vmul.f32 %v853_v62, %v1026_v56  ;;  %v393_v1 = vmul.f32 %v851_v59, %v1010_v46 }
 0x14e   : > { %866 = vrsqrt.f32 %v365_v63  ;;  %605 = vmatprep.mubr.f32.mxu0 %v876_v32  ;;  %647 = vmatprep.mubr.f32.mxu1 %v876_v32  ;;  %v474_v2 = vmul.f32 %v1164_v53, %v457_v16  ;;  %v431_v21 = vadd.f32 %v1159_v34, %v408_v45  ;;  %v458_v23 = vsub.f32 %v438_v29, %v938_v5 }
 0x14f   : > { %v855_v24 = vpop.eup %854  ;;  %v483_v26 = vadd.f32 %v467_v17, %v936_v4  ;;  %v409_v27 = vmul.f32 %v1153_v25, %v386_v18  ;;  %v416_v56 = vmul.f32 %v1153_v25, %v393_v1 }
 0x150   : > { %v857_v28 = vpop.eup %856  ;;  %v490_v46 = vadd.f32 %v474_v2, %v932_v3  ;;  %v451_v31 = vsub.f32 %v431_v21, %v942_v6  ;;  %v475_v33 = vmul.f32 %v1164_v53, %v458_v23  ;;  %v394_v39 = vmul.f32 %v855_v24, %v1029_v57 }
 0x151   : > { %606 = vmatmul.mubr.f32.gmra.mxu0 %v483_v26  ;;  %v432_v40 = vadd.f32 %v1159_v34, %v409_v27  ;;  %v439_v41 = vadd.f32 %v1159_v34, %v416_v56  ;;  %v387_v4 = vmul.f32 %v857_v28, %v1045_v19 }
 0x152   : > { %648 = vmatmul.mubr.f32.gmra.mxu1 %v490_v46  ;;  %611 = vmatprep.mubr.f32.mxu0 %v876_v32  ;;  %v468_v30 = vmul.f32 %v1164_v53, %v451_v31  ;;  %v491_v3 = vadd.f32 %v475_v33, %v938_v5  ;;  %v417_v42 = vmul.f32 %v1153_v25, %v394_v39 }
 0x153   : > { %v859_v43 = vpop.eup %858  ;;  %653 = vmatprep.mubr.f32.mxu1 %v876_v32  ;;  %v452_v57 = vsub.f32 %v432_v40, %v948_v8  ;;  %v459_v44 = vsub.f32 %v439_v41, %v944_v7  ;;  %v410_v47 = vmul.f32 %v1153_v25, %v387_v4 }
 0x154   : > { %v861_v37 = vpop.eup %860  ;;  %v484_v19 = vadd.f32 %v468_v30, %v942_v6  ;;  %v440_v22 = vadd.f32 %v1159_v34, %v417_v42  ;;  %v395_v0 = vmul.f32 %v859_v43, %v1048_v20 }
 0x155   : > { %v469_v5 = vmul.f32 %v1164_v53, %v452_v57  ;;  %v476_v48 = vmul.f32 %v1164_v53, %v459_v44  ;;  %v433_v49 = vadd.f32 %v1159_v34, %v410_v47  ;;  %v388_v52 = vmul.f32 %v861_v37, %v1067_v35 }
 0x156   : > { %612 = vmatmul.mubr.f32.gmra.mxu0 %v484_v19  ;;  %654 = vmatmul.mubr.f32.gmra.mxu1 %v491_v3  ;;  %v460_v54 = vsub.f32 %v440_v22, %v950_v9  ;;  %v418_v55 = vmul.f32 %v1153_v25, %v395_v0 }
 0x157   : > { %v863_v58 = vpop.eup %862  ;;  %617 = vmatprep.mubr.f32.mxu0 %v876_v32  ;;  %659 = vmatprep.mubr.f32.mxu1 %v876_v32  ;;  %v485_v6 = vadd.f32 %v469_v5, %v948_v8  ;;  %v492_v20 = vadd.f32 %v476_v48, %v944_v7  ;;  %v453_v59 = vsub.f32 %v433_v49, %v954_v10 }
 0x158   : > { %v865_v38 = vpop.eup %864  ;;  %v477_v35 = vmul.f32 %v1164_v53, %v460_v54  ;;  %v411_v60 = vmul.f32 %v1153_v25, %v388_v52  ;;  %v441_v61 = vadd.f32 %v1159_v34, %v418_v55  ;;  %v396_v62 = vmul.f32 %v863_v58, %v1070_v36 }
 0x159   : > { %v470_v63 = vmul.f32 %v1164_v53, %v453_v59  ;;  %v389_v16 = vmul.f32 %v865_v38, %v1086_v50 }
 0x15a   : > { %618 = vmatmul.mubr.f32.gmra.mxu0 %v485_v6  ;;  %660 = vmatmul.mubr.f32.gmra.mxu1 %v492_v20  ;;  %v493_v8 = vadd.f32 %v477_v35, %v950_v9  ;;  %v434_v7 = vadd.f32 %v1159_v34, %v411_v60  ;;  %v461_v45 = vsub.f32 %v441_v61, %v956_v11 }
 0x15b   : > { %v867_v29 = vpop.eup %866  ;;  %623 = vmatprep.mubr.f32.mxu0 %v876_v32  ;;  %665 = vmatprep.mubr.f32.mxu1 %v876_v32  ;;  %v486_v17 = vadd.f32 %v470_v63, %v954_v10  ;;  %v412_v36 = vmul.f32 %v1153_v25, %v389_v16  ;;  %v419_v18 = vmul.f32 %v1153_v25, %v396_v62 }
 0x15c   : > { %v454_v50 = vsub.f32 %v434_v7, %v960_v12  ;;  %v478_v1 = vmul.f32 %v1164_v53, %v461_v45  ;;  %v397_v9 = vmul.f32 %v867_v29, %v1089_v51 }
 0x15d   : > { %v435_v2 = vadd.f32 %v1159_v34, %v412_v36  ;;  %v442_v21 = vadd.f32 %v1159_v34, %v419_v18 }
 0x15e   : > { %624 = vmatmul.mubr.f32.gmra.mxu0 %v486_v17  ;;  %666 = vmatmul.mubr.f32.gmra.mxu1 %v493_v8  ;;  %v471_v23 = vmul.f32 %v1164_v53, %v454_v50  ;;  %v494_v10 = vadd.f32 %v478_v1, %v956_v11  ;;  %v420_v24 = vmul.f32 %v1153_v25, %v397_v9 }
 0x15f   : > { %629 = vmatprep.mubr.f32.mxu0 %v876_v32  ;;  %671 = vmatprep.mubr.f32.mxu1 %v876_v32  ;;  %v455_v26 = vsub.f32 %v435_v2, %v966_v14  ;;  %v462_v51 = vsub.f32 %v442_v21, %v962_v13 }
 0x160   : > { %v487_v27 = vadd.f32 %v471_v23, %v960_v12  ;;  %v443_v56 = vadd.f32 %v1159_v34, %v420_v24 }
 0x161   : > { %v472_v28 = vmul.f32 %v1164_v53, %v455_v26  ;;  %v479_v46 = vmul.f32 %v1164_v53, %v462_v51 }
 0x162   : > { %630 = vmatmul.mubr.f32.gmra.mxu0 %v487_v27  ;;  %672 = vmatmul.mubr.f32.gmra.mxu1 %v494_v10  ;;  %v463_v11 = vsub.f32 %v443_v56, %v968_v15 }
 0x163   : > { %635 = vmatprep.mubr.f32.mxu0 %v876_v32  ;;  %677 = vmatprep.mubr.f32.mxu1 %v876_v32  ;;  %v488_v25 = vadd.f32 %v472_v28, %v966_v14  ;;  %v495_v31 = vadd.f32 %v479_v46, %v962_v13 }
 0x164   : > { %v480_v12 = vmul.f32 %v1164_v53, %v463_v11 }
 0x166   : > { %636 = vmatmul.mubr.f32.gmra.mxu0 %v488_v25  ;;  %678 = vmatmul.mubr.f32.gmra.mxu1 %v495_v31  ;;  %v496_v34 = vadd.f32 %v480_v12, %v968_v15 }
 0x167   : > { %683 = vmatprep.mubr.f32.mxu1 %v876_v32 }
 0x16a   : > { %684 = vmatmul.mubr.f32.gmra.mxu1 %v496_v34 }
 0x208   : > { %v595_v13 = vpop.f32.mrf.mxu0 }
 0x209   : > { %690 = vst [vmem:[%s1276_s28] sm:$0xff] %v595_v13 }
 0x20a   : > { %v597_v14 = vpop.f32.mrf.mxu0 }
 0x20b   : > { %691 = vst [vmem:[%s1276_s28 + $0x8] sm:$0xff] %v597_v14 }
 0x20d   : > { %v601_v15 = vpop.f32.mrf.mxu0  ;;  %v643_v32 = vpop.f32.mrf.mxu1 }
 0x20e   : > { %692 = vst [vmem:[%s1276_s28 + $0x10] sm:$0xff] %v601_v15  ;;  %706 = vst [vmem:[%s1276_s28 + $0x80] sm:$0xff] %v643_v32 }
 0x20f   : > { %v603_v53 = vpop.f32.mrf.mxu0  ;;  %v645_v33 = vpop.f32.mrf.mxu1 }
 0x210   : > { %693 = vst [vmem:[%s1276_s28 + $0x18] sm:$0xff] %v603_v53  ;;  %707 = vst [vmem:[%s1276_s28 + $0x88] sm:$0xff] %v645_v33 }
 0x211   : > { %v607_v39 = vpop.f32.mrf.mxu0 }
 0x212   : > { %694 = vst [vmem:[%s1276_s28 + $0x20] sm:$0xff] %v607_v39  ;;  %v649_v40 = vpop.f32.mrf.mxu1 }
 0x213   : > { %708 = vst [vmem:[%s1276_s28 + $0x90] sm:$0xff] %v649_v40  ;;  %v609_v41 = vpop.f32.mrf.mxu0 }
 0x214   : > { %695 = vst [vmem:[%s1276_s28 + $0x28] sm:$0xff] %v609_v41  ;;  %v651_v4 = vpop.f32.mrf.mxu1 }
 0x215   : > { %709 = vst [vmem:[%s1276_s28 + $0x98] sm:$0xff] %v651_v4 }
 0x216   : > { %v613_v30 = vpop.f32.mrf.mxu0  ;;  %v655_v3 = vpop.f32.mrf.mxu1 }
 0x217   : > { %696 = vst [vmem:[%s1276_s28 + $0x30] sm:$0xff] %v613_v30  ;;  %710 = vst [vmem:[%s1276_s28 + $0xa0] sm:$0xff] %v655_v3 }
 0x218   : > { %v615_v42 = vpop.f32.mrf.mxu0  ;;  %v657_v43 = vpop.f32.mrf.mxu1 }
 0x219   : > { %697 = vst [vmem:[%s1276_s28 + $0x38] sm:$0xff] %v615_v42  ;;  %711 = vst [vmem:[%s1276_s28 + $0xa8] sm:$0xff] %v657_v43 }
 0x21a   : > { %v619_v57 = vpop.f32.mrf.mxu0  ;;  %v661_v44 = vpop.f32.mrf.mxu1 }
 0x21b   : > { %698 = vst [vmem:[%s1276_s28 + $0x40] sm:$0xff] %v619_v57  ;;  %712 = vst [vmem:[%s1276_s28 + $0xb0] sm:$0xff] %v661_v44 }
 0x21c   : > { %v621_v47 = vpop.f32.mrf.mxu0  ;;  %v663_v37 = vpop.f32.mrf.mxu1 }
 0x21d   : > { %699 = vst [vmem:[%s1276_s28 + $0x48] sm:$0xff] %v621_v47  ;;  %713 = vst [vmem:[%s1276_s28 + $0xb8] sm:$0xff] %v663_v37 }
 0x21e   : > { %v625_v19 = vpop.f32.mrf.mxu0  ;;  %v667_v22 = vpop.f32.mrf.mxu1 }
 0x21f   : > { %700 = vst [vmem:[%s1276_s28 + $0x50] sm:$0xff] %v625_v19  ;;  %714 = vst [vmem:[%s1276_s28 + $0xc0] sm:$0xff] %v667_v22 }
 0x220   : > { %v627_v0 = vpop.f32.mrf.mxu0  ;;  %v669_v5 = vpop.f32.mrf.mxu1 }
 0x221   : > { %701 = vst [vmem:[%s1276_s28 + $0x58] sm:$0xff] %v627_v0  ;;  %715 = vst [vmem:[%s1276_s28 + $0xc8] sm:$0xff] %v669_v5 }
 0x222   : > { %v631_v48 = vpop.f32.mrf.mxu0  ;;  %v673_v49 = vpop.f32.mrf.mxu1 }
 0x223   : > { %702 = vst [vmem:[%s1276_s28 + $0x60] sm:$0xff] %v631_v48  ;;  %716 = vst [vmem:[%s1276_s28 + $0xd0] sm:$0xff] %v673_v49 }
 0x224   : > { %v633_v52 = vpop.f32.mrf.mxu0  ;;  %v675_v54 = vpop.f32.mrf.mxu1 }
 0x225   : > { %703 = vst [vmem:[%s1276_s28 + $0x68] sm:$0xff] %v633_v52  ;;  %717 = vst [vmem:[%s1276_s28 + $0xd8] sm:$0xff] %v675_v54 }
 0x226   : > { %v637_v55 = vpop.f32.mrf.mxu0  ;;  %v679_v58 = vpop.f32.mrf.mxu1 }
 0x227   : > { %704 = vst [vmem:[%s1276_s28 + $0x70] sm:$0xff] %v637_v55  ;;  %718 = vst [vmem:[%s1276_s28 + $0xe0] sm:$0xff] %v679_v58 }
 0x228   : > { %v639_v6 = vpop.f32.mrf.mxu0  ;;  %v681_v20 = vpop.f32.mrf.mxu1 }
 0x229   : > { %705 = vst [vmem:[%s1276_s28 + $0x78] sm:$0xff] %v639_v6  ;;  %719 = vst [vmem:[%s1276_s28 + $0xe8] sm:$0xff] %v681_v20 }
 0x22a   : > { %v685_v59 = vpop.f32.mrf.mxu1 }
 0x22b   : > { %720 = vst [vmem:[%s1276_s28 + $0xf0] sm:$0xff] %v685_v59 }
 0x22c   : > { %v687_v38 = vpop.f32.mrf.mxu1 }
 0x22d   : > { %721 = vst [vmem:[%s1276_s28 + $0xf8] sm:$0xff] %v687_v38 }
 0x22e PF: > { %s16_s20 = sadd.s32 1, %s874_s20  }
 0x22f   : > { %p13_p5 = scmp.ge.s32.totalorder %s16_s20, 4  }
 0x231   :  { %15 = sbr.rel (!%p13_p5) target bundleno = 2 (0x2), region = 66 }

// kernel: attention_pallas.7
= control target key start
LH: loop header
LB: loop body
LE: loop exit
PB: predicated region body
PF: predicated region fallthrough
CT: control target
= control target key end

     0   :  { %10 = vsyncpa [#allocation4], 0  ;;  %s2240_s0 = inlined_call_operand.vmem [shape: f32[2,2,128,128], index: 0, kind: input, shape index: {}]   ;;  %s2241_s1 = inlined_call_operand.vmem [shape: f32[2,2,128,128], index: 1, kind: input, shape index: {}]   ;;  %s2242_s2 = inlined_call_operand.vmem [shape: f32[2,2,128,128], index: 2, kind: input, shape index: {}]   ;;  %s2243_s3 = inlined_call_operand.vmem [shape: f32[2,128,128], index: 3, kind: input, shape index: {}]   ;;  %s2244_s4 = inlined_call_operand.vmem [shape: f32[1,128], index: 4, kind: input, shape index: {}]   ;;  %s2245_s5 = inlined_call_operand.hbm [shape: f32[2,128,128], index: 5, kind: output, shape index: {}]  }
   0x1   :  { %12 = vsyncpa [#allocation4 + $0x1], 0  ;;  %s1867_s18 = smov 0   ;;  %s1869_s19 = smov 0  }
   0x2   :  { %s1871_s20 = smov 0   ;;  %s1873_s21 = smov 0  }
   0x3   :  { %s1875_s22 = smov 0   ;;  %s1877_s23 = smov 0  }
   0x4   :  { %s1879_s24 = smov 0   ;;  %s1881_s25 = smov 0  }
   0x5 LB: > { %2251 = sst [smem:[#allocation6_spill]] %s1811_s20  ;;  %s1310_s26 = sadd.s32 4294967295, %s1831_s25   ;;  %s1831_s25 = sphi %s1881_s25, %s18_s25   ;;  %s1827_s24 = sphi %s1879_s24, %s2268_s24   ;;  %s1823_s23 = sphi %s1877_s23, %s2264_s23   ;;  %s1819_s22 = sphi %s1875_s22, %s2263_s22   ;;  %s1815_s21 = sphi %s1873_s21, %s2262_s21   ;;  %s1811_s20 = sphi %s1871_s20, %s2261_s20   ;;  %s1807_s19 = sphi %s1869_s19, %s2267_s19   ;;  %s1803_s18 = sphi %s1867_s18, %s2266_s18  }
   0x6   : > { %2252 = sst [smem:[#allocation7_spill]] %s1823_s23  ;;  %s1311_s27 = sadd.s32 4294967294, %s1831_s25  }
   0x7   : > { %2253 = sst [smem:[#allocation8_spill]] %s1827_s24  ;;  %s30_s28 = sadd.s32 1, %s1823_s23 }
   0x8   : > { %p31_p0 = scmp.ge.s32.totalorder %s30_s28, 2  ;;  %s37_s29 = sadd.s32 1, %s1827_s24 }
   0x9   : > { %p189_p1 = scmp.ne.s32.totalorder %s1811_s20, %s1807_s19  ;;  %p190_p2 = scmp.eq.s32.totalorder %s1310_s26, 3 }
   0xa   : > { %s2270_s28 = smov (%p31_p0, %s30_s28), 0  ;;  %s2272_s29 = smov (!%p31_p0, %s37_s29), %s1827_s24 }
   0xb   : > { %2254 = sst [smem:[#allocation9_spill]] %s2270_s28  ;;  %p1916_p3 = por %p190_p2, %p189_p1 }
   0xc   : > { %p195_p4 = scmp.ne.s32.totalorder %s1807_s19, %s1803_s18  ;;  %p39_p5 = scmp.ge.s32.totalorder %s2272_s29, 2 }
   0xd   : > { %p196_p6 = scmp.eq.s32.totalorder %s1311_s27, 3  ;;  %p1314_p7 = scmp.ge.s32.totalorder %s1831_s25, 1 }
   0xe   : > { %p266_p8 = scmp.lt.s32.totalorder %s1831_s25, 5  ;;  %s2274_s29 = smov (%p39_p5, %s2272_s29), 0 }
   0xf   : > { %2256 = sst [smem:[#allocation10_spill]] %s2274_s29  ;;  %p1926_p9 = por %p196_p6, %p195_p4 }
  0x10   : > { %p267_p10 = pnand %p1314_p7, %p266_p8  ;;  %s174_s7 = ssub.s32 %s1827_s24, %s2274_s29 }
  0x11   : > { %s179_s8 = sadd.s32 1, %s1811_s20  ;;  %p177_p11 = scmp.eq.s32.totalorder %s174_s7, 0 }
  0x12   : > { %270 = sbr.rel (%p267_p10) target bundleno = 1078 (0x436), region = 40  ;;  %s2249_s10 = sand.u32 (!%p267_p10), 1, %s1807_s19  }
  0x13   : > { %s1934_s9 = scalar_select %p177_p11, %s1811_s20, %s179_s8  }
  0x14   : > { %p326_p12 = scmp.lt.s32.totalorder (!%p267_p10), %s1819_s22, 1  ;;  %s1315_s11 = sshll.u32 (!%p267_p10), %s2249_s10, 7 }
  0x15   : > { %2258 = sst [smem:[#allocation11_spill]] %s1934_s9  ;;  %p328_p13 = scmp.lt.s32.totalorder (!%p267_p10), %s1815_s21, 1 }
  0x16   : > { %p1327_p0 = scmp.ne.s32.totalorder (!%p267_p10), %s1815_s21, 0 }
  0x17   : > { %s327_s12 = scalar_select %p326_p12, %s1819_s22, 1 }
  0x18   : > { %s329_s13 = scalar_select %p328_p13, %s1815_s21, 1 }
  0x19   : > { %s1317_s14 = sshll.u32 %s327_s12, 5 }
  0x1a   : > { %s1316_s15 = sshll.u32 %s329_s13, 4  ;;  %s1335_s16 = sshll.u32 %s329_s13, 7 }
  0x1b   : > { %s335_s17 = sadd.s32 %s1317_s14, %s1316_s15  ;;  %s1946_s7 = scalar_lea.vmem %s2243_s3, %s1335_s16 }
  0x1c   : > { %s1318_s8 = sshll.u32 %s335_s17, 3  ;;  %s1963_s14 = scalar_lea.vmem [#allocation3], %s1315_s11 }
  0x1d   : > { %s1951_s24 = scalar_lea.vmem %s2240_s0, %s1318_s8  ;;  %s1956_s9 = scalar_lea.vmem %s2241_s1, %s1318_s8 }
  0x1e   : > { %s1961_s13 = scalar_lea.vmem %s2242_s2, %s1318_s8  ;;  %366 = sbr.rel (%p1327_p0) target bundleno = 44 (0x2c), region = 44 }
  0x23   : > { %v1833_v0 = vmov 0.0  }
  0x24   : > { %367 = vst [vmem:[#allocation2 + $0x30] sm:$0xff] %v1833_v0  ;;  %368 = vst [vmem:[#allocation2] sm:$0xff] %v1833_v0 }
  0x25   : > { %369 = vst [vmem:[#allocation2 + $0x58] sm:$0xff] %v1833_v0  ;;  %370 = vst [vmem:[#allocation2 + $0x18] sm:$0xff] %v1833_v0 }
  0x26   : > { %371 = vst [vmem:[#allocation2 + $0x50] sm:$0xff] %v1833_v0  ;;  %372 = vst [vmem:[#allocation2 + $0x68] sm:$0xff] %v1833_v0 }
  0x27   : > { %373 = vst [vmem:[#allocation2 + $0x8] sm:$0xff] %v1833_v0  ;;  %374 = vst [vmem:[#allocation2 + $0x48] sm:$0xff] %v1833_v0 }
  0x28   : > { %375 = vst [vmem:[#allocation2 + $0x40] sm:$0xff] %v1833_v0  ;;  %376 = vst [vmem:[#allocation2 + $0x20] sm:$0xff] %v1833_v0 }
  0x29   : > { %377 = vst [vmem:[#allocation2 + $0x10] sm:$0xff] %v1833_v0  ;;  %378 = vst [vmem:[#allocation2 + $0x38] sm:$0xff] %v1833_v0 }
  0x2a   : > { %379 = vst [vmem:[#allocation2 + $0x60] sm:$0xff] %v1833_v0  ;;  %380 = vst [vmem:[#allocation2 + $0x70] sm:$0xff] %v1833_v0 }
  0x2b   : > { %381 = vst [vmem:[#allocation2 + $0x78] sm:$0xff] %v1833_v0  ;;  %382 = vst [vmem:[#allocation2 + $0x28] sm:$0xff] %v1833_v0 }
  0x2c PF: > { %v414_v1 = vld [vmem:[%s1956_s9 + $0x78] sm:$0xff]  ;;  %v413_v2 = vld [vmem:[%s1956_s9 + $0x70] sm:$0xff]  ;;  %v412_v3 = vld [vmem:[%s1956_s9 + $0x68] sm:$0xff]  ;;  %p1328_p1 = scmp.ne.s32.totalorder %s1815_s21, 1 }
  0x2d   : > { %1433 = vmatprep.subr.mxu0 %v414_v1  ;;  %v383_v4 = vld [vmem:[%s1951_s24] sm:$0xff]  ;;  %v410_v6 = vld [vmem:[%s1956_s9 + $0x58] sm:$0xff]  ;;  %v409_v7 = vld [vmem:[%s1956_s9 + $0x50] sm:$0xff] }
  0x2e   : > { %1434 = vmatpush3.xpose.msra.mxu0 %v414_v1  ;;  %1465 = vmatprep.mubr.f32.mxu0 %v383_v4  ;;  %v411_v5 = vld [vmem:[%s1956_s9 + $0x60] sm:$0xff]  ;;  %v408_v8 = vld [vmem:[%s1956_s9 + $0x48] sm:$0xff]  ;;  %v406_v10 = vld [vmem:[%s1956_s9 + $0x38] sm:$0xff] }
  0x2f   : > { %1435 = vmatprep.subr.mxu0 %v413_v2  ;;  %v407_v9 = vld [vmem:[%s1956_s9 + $0x40] sm:$0xff]  ;;  %v405_v11 = vld [vmem:[%s1956_s9 + $0x30] sm:$0xff]  ;;  %v404_v12 = vld [vmem:[%s1956_s9 + $0x28] sm:$0xff] }
  0x30   : > { %v403_v13 = vld [vmem:[%s1956_s9 + $0x20] sm:$0xff]  ;;  %v402_v14 = vld [vmem:[%s1956_s9 + $0x18] sm:$0xff]  ;;  %v401_v15 = vld [vmem:[%s1956_s9 + $0x10] sm:$0xff] }
  0x31   : > { %v400_v16 = vld [vmem:[%s1956_s9 + $0x8] sm:$0xff]  ;;  %v399_v17 = vld [vmem:[%s1956_s9] sm:$0xff]  ;;  %v385_v19 = vld [vmem:[%s1951_s24 + $0x10] sm:$0xff] }
  0x32   : > { %1436 = vmatpush3.xpose.msra.mxu0 %v413_v2  ;;  %v384_v18 = vld [vmem:[%s1951_s24 + $0x8] sm:$0xff]  ;;  %v386_v20 = vld [vmem:[%s1951_s24 + $0x18] sm:$0xff]  ;;  %v387_v21 = vld [vmem:[%s1951_s24 + $0x20] sm:$0xff] }
  0x33   : > { %1437 = vmatprep.subr.mxu0 %v412_v3  ;;  %v388_v22 = vld [vmem:[%s1951_s24 + $0x28] sm:$0xff]  ;;  %v389_v23 = vld [vmem:[%s1951_s24 + $0x30] sm:$0xff]  ;;  %v390_v24 = vld [vmem:[%s1951_s24 + $0x38] sm:$0xff] }
  0x34   : > { %v391_v25 = vld [vmem:[%s1951_s24 + $0x40] sm:$0xff]  ;;  %v392_v26 = vld [vmem:[%s1951_s24 + $0x48] sm:$0xff]  ;;  %v393_v27 = vld [vmem:[%s1951_s24 + $0x50] sm:$0xff] }
  0x35   : > { %v394_v28 = vld [vmem:[%s1951_s24 + $0x58] sm:$0xff]  ;;  %v395_v29 = vld [vmem:[%s1951_s24 + $0x60] sm:$0xff]  ;;  %v396_v30 = vld [vmem:[%s1951_s24 + $0x68] sm:$0xff] }
  0x36   : > { %1438 = vmatpush3.xpose.msra.mxu0 %v412_v3  ;;  %v397_v31 = vld [vmem:[%s1951_s24 + $0x70] sm:$0xff]  ;;  %v398_v32 = vld [vmem:[%s1951_s24 + $0x78] sm:$0xff]  ;;  %v428_v3 = vld [vmem:[%s1961_s13 + $0x68] sm:$0xff] }
  0x37   : > { %1439 = vmatprep.subr.mxu0 %v411_v5  ;;  %v430_v1 = vld [vmem:[%s1961_s13 + $0x78] sm:$0xff]  ;;  %v429_v2 = vld [vmem:[%s1961_s13 + $0x70] sm:$0xff]  ;;  %v427_v4 = vld [vmem:[%s1961_s13 + $0x60] sm:$0xff] }
  0x38   : > { %1489 = vmatprep.subr.mxu1 %v430_v1 }
  0x39   : > { %1490 = vmatpush3.msra.mxu1 %v430_v1 }
  0x3a   : > { %1440 = vmatpush3.xpose.msra.mxu0 %v411_v5  ;;  %1491 = vmatprep.subr.mxu1 %v429_v2  ;;  %v426_v5 = vld [vmem:[%s1961_s13 + $0x58] sm:$0xff] }
  0x3b   : > { %1441 = vmatprep.subr.mxu0 %v410_v6  ;;  %1492 = vmatpush3.msra.mxu1 %v429_v2  ;;  %v421_v2 = vld [vmem:[%s1961_s13 + $0x30] sm:$0xff] }
  0x3c   : > { %1493 = vmatprep.subr.mxu1 %v428_v3 }
  0x3d   : > { %1494 = vmatpush3.msra.mxu1 %v428_v3 }
  0x3e   : > { %1442 = vmatpush3.xpose.msra.mxu0 %v410_v6  ;;  %1495 = vmatprep.subr.mxu1 %v427_v4  ;;  %v425_v6 = vld [vmem:[%s1961_s13 + $0x50] sm:$0xff] }
  0x3f   : > { %1443 = vmatprep.subr.mxu0 %v409_v7  ;;  %1496 = vmatpush3.msra.mxu1 %v427_v4 }
  0x40   : > { %1497 = vmatprep.subr.mxu1 %v426_v5 }
  0x41   : > { %1498 = vmatpush3.msra.mxu1 %v426_v5 }
  0x42   : > { %1444 = vmatpush3.xpose.msra.mxu0 %v409_v7  ;;  %1499 = vmatprep.subr.mxu1 %v425_v6 }
  0x43   : > { %1445 = vmatprep.subr.mxu0 %v408_v8  ;;  %1500 = vmatpush3.msra.mxu1 %v425_v6  ;;  %v419_v6 = vld [vmem:[%s1961_s13 + $0x20] sm:$0xff] }
  0x46   : > { %1446 = vmatpush3.xpose.msra.mxu0 %v408_v8 }
  0x47   : > { %1447 = vmatprep.subr.mxu0 %v407_v9 }
  0x4a   : > { %1448 = vmatpush3.xpose.msra.mxu0 %v407_v9 }
  0x4b   : > { %1449 = vmatprep.subr.mxu0 %v406_v10 }
  0x4e   : > { %1450 = vmatpush3.xpose.msra.mxu0 %v406_v10 }
  0x4f   : > { %1451 = vmatprep.subr.mxu0 %v405_v11 }
  0x52   : > { %1452 = vmatpush3.xpose.msra.mxu0 %v405_v11 }
  0x53   : > { %1453 = vmatprep.subr.mxu0 %v404_v12 }
  0x56   : > { %1454 = vmatpush3.xpose.msra.mxu0 %v404_v12 }
  0x57   : > { %1455 = vmatprep.subr.mxu0 %v403_v13 }
  0x5a   : > { %1456 = vmatpush3.xpose.msra.mxu0 %v403_v13 }
  0x5b   : > { %1457 = vmatprep.subr.mxu0 %v402_v14 }
  0x5e   : > { %1458 = vmatpush3.xpose.msra.mxu0 %v402_v14 }
  0x5f   : > { %1459 = vmatprep.subr.mxu0 %v401_v15 }
  0x62   : > { %1460 = vmatpush3.xpose.msra.mxu0 %v401_v15 }
  0x63   : > { %1461 = vmatprep.subr.mxu0 %v400_v16 }
  0x66   : > { %1462 = vmatpush3.xpose.msra.mxu0 %v400_v16 }
  0x67   : > { %1463 = vmatprep.subr.mxu0 %v399_v17 }
  0x6a   : > { %1464 = vmatpush3.xpose.msra.mxu0 %v399_v17 }
  0x6d   : > { %1466 = vmatmul.mubr.f32.vlgmr.msra.gmra.mxu0 %v384_v18 }
  0x6e   : > { %1468 = vmatprep.mubr.f32.mxu0 %v385_v19 }
  0x71   : > { %1469 = vmatmul.mubr.f32.gmra.mxu0 %v386_v20 }
  0x72   : > { %1471 = vmatprep.mubr.f32.mxu0 %v387_v21 }
  0x75   : > { %1472 = vmatmul.mubr.f32.gmra.mxu0 %v388_v22 }
  0x76   : > { %1474 = vmatprep.mubr.f32.mxu0 %v389_v23 }
  0x79   : > { %1475 = vmatmul.mubr.f32.gmra.mxu0 %v390_v24 }
  0x7a   : > { %1477 = vmatprep.mubr.f32.mxu0 %v391_v25 }
  0x7d   : > { %1478 = vmatmul.mubr.f32.gmra.mxu0 %v392_v26 }
  0x7e   : > { %1480 = vmatprep.mubr.f32.mxu0 %v393_v27 }
  0x81   : > { %1481 = vmatmul.mubr.f32.gmra.mxu0 %v394_v28 }
  0x82   : > { %1483 = vmatprep.mubr.f32.mxu0 %v395_v29 }
  0x85   : > { %1484 = vmatmul.mubr.f32.gmra.mxu0 %v396_v30 }
  0x86   : > { %1486 = vmatprep.mubr.f32.mxu0 %v397_v31 }
  0x89   : > { %1487 = vmatmul.mubr.f32.gmra.mxu0 %v398_v32 }
 0x12d   : > { %v1467_v33 = vpop.f32.mrf.mxu0 }
 0x12e   : > { %v2001_v38 = vmul.f32 0.088388346, %v1467_v33 }
 0x12f   : > { %v497_v34 = vpop.f32.mrf.mxu0 }
 0x130   : > { %v1998_v35 = vmul.f32 0.088388346, %v497_v34 }
 0x131   : > { %v1470_v36 = vpop.f32.mrf.mxu0 }
 0x132   : > { %592 = vmax.xlane.f32.xlu0 %v1998_v35  ;;  %v2007_v42 = vmul.f32 0.088388346, %v1470_v36 }
 0x133   : > { %v507_v37 = vpop.f32.mrf.mxu0 }
 0x134   : > { %v2003_v39 = vmul.f32 0.088388346, %v507_v37 }
 0x135   : > { %v1473_v40 = vpop.f32.mrf.mxu0 }
 0x136   : > { %594 = vmax.xlane.f32.xlu0 %v2001_v38  ;;  %596 = vmax.xlane.f32.xlu1 %v2003_v39  ;;  %v2013_v46 = vmul.f32 0.088388346, %v1473_v40 }
 0x137   : > { %v517_v41 = vpop.f32.mrf.mxu0 }
 0x138   : > { %v2009_v43 = vmul.f32 0.088388346, %v517_v41 }
 0x139   : > { %v1476_v44 = vpop.f32.mrf.mxu0 }
 0x13a   : > { %598 = vmax.xlane.f32.xlu1 %v2007_v42  ;;  %600 = vmax.xlane.f32.xlu0 %v2009_v43  ;;  %v2019_v50 = vmul.f32 0.088388346, %v1476_v44 }
 0x13b   : > { %v527_v45 = vpop.f32.mrf.mxu0 }
 0x13c   : > { %v2015_v47 = vmul.f32 0.088388346, %v527_v45 }
 0x13d   : > { %v1479_v48 = vpop.f32.mrf.mxu0 }
 0x13e   : > { %602 = vmax.xlane.f32.xlu1 %v2013_v46  ;;  %604 = vmax.xlane.f32.xlu0 %v2015_v47  ;;  %v2025_v54 = vmul.f32 0.088388346, %v1479_v48 }
 0x13f   : > { %v537_v49 = vpop.f32.mrf.mxu0 }
 0x140   : > { %v2021_v51 = vmul.f32 0.088388346, %v537_v49 }
 0x141   : > { %v1482_v52 = vpop.f32.mrf.mxu0 }
 0x142   : > { %606 = vmax.xlane.f32.xlu1 %v2019_v50  ;;  %608 = vmax.xlane.f32.xlu0 %v2021_v51  ;;  %v2031_v58 = vmul.f32 0.088388346, %v1482_v52 }
 0x143   : > { %v547_v53 = vpop.f32.mrf.mxu0 }
 0x144   : > { %v2027_v55 = vmul.f32 0.088388346, %v547_v53 }
 0x145   : > { %v1485_v56 = vpop.f32.mrf.mxu0 }
 0x146   : > { %610 = vmax.xlane.f32.xlu1 %v2025_v54  ;;  %612 = vmax.xlane.f32.xlu0 %v2027_v55  ;;  %v2037_v62 = vmul.f32 0.088388346, %v1485_v56  ;;  %v423_v56 = vld [vmem:[%s1961_s13 + $0x40] sm:$0xff] }
 0x147   : > { %v557_v57 = vpop.f32.mrf.mxu0 }
 0x148   : > { %v2033_v59 = vmul.f32 0.088388346, %v557_v57 }
 0x149   : > { %v1488_v60 = vpop.f32.mrf.mxu0 }
 0x14a   : > { %614 = vmax.xlane.f32.xlu1 %v2031_v58  ;;  %616 = vmax.xlane.f32.xlu0 %v2033_v59  ;;  %v2043_v0 = vmul.f32 0.088388346, %v1488_v60 }
 0x14b   : > { %v567_v61 = vpop.f32.mrf.mxu0 }
 0x14c   : > { %v2039_v63 = vmul.f32 0.088388346, %v567_v61 }
 0x14e   : > { %618 = vmax.xlane.f32.xlu1 %v2037_v62  ;;  %620 = vmax.xlane.f32.xlu0 %v2039_v63 }
 0x152   : > { %622 = vmax.xlane.f32.xlu1 %v2043_v0 }
 0x1bb   : > { %v593_v7 = vpop.xlane.xlu0 %592 }
 0x1bc   : > { %v624_v8 = vsub.f32 %v1998_v35, %v593_v7 }
 0x1be   : > { %v640_v9 = vmul.f32 1.442695, %v624_v8  ;;  %v418_v8 = vld [vmem:[%s1961_s13 + $0x18] sm:$0xff] }
 0x1bf   : > { %v595_v10 = vpop.xlane.xlu0 %594  ;;  %v597_v11 = vpop.xlane.xlu1 %596 }
 0x1c0   : > { %1675 = vpow2.f32 %v640_v9  ;;  %v625_v12 = vsub.f32 %v2001_v38, %v595_v10  ;;  %v626_v13 = vsub.f32 %v2003_v39, %v597_v11  ;;  %v417_v10 = vld [vmem:[%s1961_s13 + $0x10] sm:$0xff] }
 0x1c2   : > { %v642_v14 = vmul.f32 1.442695, %v625_v12  ;;  %v644_v15 = vmul.f32 1.442695, %v626_v13  ;;  %v416_v12 = vld [vmem:[%s1961_s13 + $0x8] sm:$0xff] }
 0x1c3   : > { %v599_v16 = vpop.xlane.xlu1 %598  ;;  %v601_v17 = vpop.xlane.xlu0 %600 }
 0x1c4   : > { %1677 = vpow2.f32 %v642_v14  ;;  %v627_v18 = vsub.f32 %v2007_v42, %v599_v16  ;;  %v628_v19 = vsub.f32 %v2009_v43, %v601_v17  ;;  %v415_v14 = vld [vmem:[%s1961_s13] sm:$0xff]  ;;  %v912_v17 = vld [vmem:[%s1946_s7 + $0x78] sm:$0xff] }
 0x1c5   : > { %1679 = vpow2.f32 %v644_v15 }
 0x1c6   : > { %v646_v20 = vmul.f32 1.442695, %v627_v18  ;;  %v648_v21 = vmul.f32 1.442695, %v628_v19 }
 0x1c7   : > { %v603_v22 = vpop.xlane.xlu1 %602  ;;  %v605_v23 = vpop.xlane.xlu0 %604 }
 0x1c8   : > { %1681 = vpow2.f32 %v646_v20  ;;  %v629_v24 = vsub.f32 %v2013_v46, %v603_v22  ;;  %v630_v25 = vsub.f32 %v2015_v47, %v605_v23 }
 0x1c9   : > { %1683 = vpow2.f32 %v648_v21 }
 0x1ca   : > { %v650_v26 = vmul.f32 1.442695, %v629_v24  ;;  %v652_v27 = vmul.f32 1.442695, %v630_v25 }
 0x1cb   : > { %v607_v28 = vpop.xlane.xlu1 %606  ;;  %v609_v29 = vpop.xlane.xlu0 %608 }
 0x1cc   : > { %1685 = vpow2.f32 %v650_v26  ;;  %v631_v30 = vsub.f32 %v2019_v50, %v607_v28  ;;  %v632_v31 = vsub.f32 %v2021_v51, %v609_v29 }
 0x1cd   : > { %v2061_v32 = vpop.eup %1675  ;;  %1687 = vpow2.f32 %v652_v27 }
 0x1ce   : > { %v654_v33 = vmul.f32 1.442695, %v631_v30  ;;  %v656_v34 = vmul.f32 1.442695, %v632_v31  ;;  %672 = vadd.xlane.f32.xlu0 %v2061_v32 }
 0x1cf   : > { %v611_v35 = vpop.xlane.xlu1 %610  ;;  %v613_v36 = vpop.xlane.xlu0 %612 }
 0x1d0   : > { %1689 = vpow2.f32 %v654_v33  ;;  %v633_v37 = vsub.f32 %v2025_v54, %v611_v35  ;;  %v634_v38 = vsub.f32 %v2027_v55, %v613_v36  ;;  %v424_v55 = vld [vmem:[%s1961_s13 + $0x48] sm:$0xff]  ;;  %v911_v35 = vld [vmem:[%s1946_s7 + $0x70] sm:$0xff] }
 0x1d1   : > { %v2066_v39 = vpop.eup %1677  ;;  %1691 = vpow2.f32 %v656_v34  ;;  %1501 = vmatprep.subr.mxu1 %v424_v55 }
 0x1d2   : > { %v2068_v40 = vpop.eup %1679  ;;  %v658_v41 = vmul.f32 1.442695, %v633_v37  ;;  %v660_v42 = vmul.f32 1.442695, %v634_v38  ;;  %674 = vadd.xlane.f32.xlu1 %v2066_v39  ;;  %1502 = vmatpush3.msra.mxu1 %v424_v55 }
 0x1d3   : > { %676 = vadd.xlane.f32.xlu0 %v2068_v40  ;;  %v615_v43 = vpop.xlane.xlu1 %614  ;;  %v617_v44 = vpop.xlane.xlu0 %616  ;;  %1503 = vmatprep.subr.mxu1 %v423_v56 }
 0x1d4   : > { %1693 = vpow2.f32 %v658_v41  ;;  %v635_v45 = vsub.f32 %v2031_v58, %v615_v43  ;;  %v636_v46 = vsub.f32 %v2033_v59, %v617_v44  ;;  %1504 = vmatpush3.msra.mxu1 %v423_v56 }
 0x1d5   : > { %v2074_v47 = vpop.eup %1681  ;;  %1695 = vpow2.f32 %v660_v42 }
 0x1d6   : > { %v2076_v48 = vpop.eup %1683  ;;  %v662_v49 = vmul.f32 1.442695, %v635_v45  ;;  %v664_v50 = vmul.f32 1.442695, %v636_v46  ;;  %678 = vadd.xlane.f32.xlu1 %v2074_v47  ;;  %v908_v45 = vld [vmem:[%s1946_s7 + $0x58] sm:$0xff] }
 0x1d7   : > { %680 = vadd.xlane.f32.xlu0 %v2076_v48  ;;  %v619_v51 = vpop.xlane.xlu1 %618  ;;  %v621_v52 = vpop.xlane.xlu0 %620 }
 0x1d8   : > { %1697 = vpow2.f32 %v662_v49  ;;  %v637_v53 = vsub.f32 %v2037_v62, %v619_v51  ;;  %v638_v54 = vsub.f32 %v2039_v63, %v621_v52  ;;  %v422_v63 = vld [vmem:[%s1961_s13 + $0x38] sm:$0xff] }
 0x1d9   : > { %v2084_v57 = vpop.eup %1685  ;;  %1699 = vpow2.f32 %v664_v50  ;;  %1505 = vmatprep.subr.mxu1 %v422_v63  ;;  %v907_v50 = vld [vmem:[%s1946_s7 + $0x50] sm:$0xff] }
 0x1da   : > { %v2086_v58 = vpop.eup %1687  ;;  %v666_v59 = vmul.f32 1.442695, %v637_v53  ;;  %v668_v60 = vmul.f32 1.442695, %v638_v54  ;;  %682 = vadd.xlane.f32.xlu1 %v2084_v57  ;;  %1506 = vmatpush3.msra.mxu1 %v422_v63  ;;  %v906_v53 = vld [vmem:[%s1946_s7 + $0x48] sm:$0xff] }
 0x1db   : > { %684 = vadd.xlane.f32.xlu0 %v2086_v58  ;;  %v623_v61 = vpop.xlane.xlu1 %622  ;;  %1507 = vmatprep.subr.mxu1 %v421_v2 }
 0x1dc   : > { %1701 = vpow2.f32 %v666_v59  ;;  %v639_v62 = vsub.f32 %v2043_v0, %v623_v61  ;;  %1508 = vmatpush3.msra.mxu1 %v421_v2  ;;  %v420_v0 = vld [vmem:[%s1961_s13 + $0x28] sm:$0xff] }
 0x1dd   : > { %v2092_v1 = vpop.eup %1689  ;;  %1703 = vpow2.f32 %v668_v60  ;;  %1509 = vmatprep.subr.mxu1 %v420_v0  ;;  %v904_v60 = vld [vmem:[%s1946_s7 + $0x38] sm:$0xff] }
 0x1de   : > { %v2095_v3 = vpop.eup %1691  ;;  %v670_v4 = vmul.f32 1.442695, %v639_v62  ;;  %686 = vadd.xlane.f32.xlu1 %v2092_v1  ;;  %1510 = vmatpush3.msra.mxu1 %v420_v0 }
 0x1df   : > { %688 = vadd.xlane.f32.xlu0 %v2095_v3  ;;  %1511 = vmatprep.subr.mxu1 %v419_v6 }
 0x1e0   : > { %1705 = vpow2.f32 %v670_v4  ;;  %1512 = vmatpush3.msra.mxu1 %v419_v6  ;;  %v901_v6 = vld [vmem:[%s1946_s7 + $0x20] sm:$0xff] }
 0x1e1   : > { %v2100_v5 = vpop.eup %1693  ;;  %1513 = vmatprep.subr.mxu1 %v418_v8 }
 0x1e2   : > { %v2103_v7 = vpop.eup %1695  ;;  %690 = vadd.xlane.f32.xlu1 %v2100_v5  ;;  %1514 = vmatpush3.msra.mxu1 %v418_v8  ;;  %v900_v8 = vld [vmem:[%s1946_s7 + $0x18] sm:$0xff] }
 0x1e3   : > { %692 = vadd.xlane.f32.xlu0 %v2103_v7  ;;  %1515 = vmatprep.subr.mxu1 %v417_v10 }
 0x1e4   : > { %1516 = vmatpush3.msra.mxu1 %v417_v10 }
 0x1e5   : > { %v2108_v9 = vpop.eup %1697  ;;  %1517 = vmatprep.subr.mxu1 %v416_v12 }
 0x1e6   : > { %v2111_v11 = vpop.eup %1699  ;;  %694 = vadd.xlane.f32.xlu1 %v2108_v9  ;;  %1518 = vmatpush3.msra.mxu1 %v416_v12 }
 0x1e7   : > { %696 = vadd.xlane.f32.xlu0 %v2111_v11  ;;  %1519 = vmatprep.subr.mxu1 %v415_v14 }
 0x1e8   : > { %1520 = vmatpush3.msra.mxu1 %v415_v14  ;;  %v899_v14 = vld [vmem:[%s1946_s7 + $0x10] sm:$0xff] }
 0x1e9   : > { %v2116_v13 = vpop.eup %1701  ;;  %1545 = vmatprep.subr.mxu1 %v912_v17 }
 0x1ea   : > { %v2119_v15 = vpop.eup %1703  ;;  %698 = vadd.xlane.f32.xlu1 %v2116_v13 }
 0x1eb   : > { %700 = vadd.xlane.f32.xlu0 %v2119_v15 }
 0x1ed   : > { %v2123_v16 = vpop.eup %1705 }
 0x1ee   : > { %702 = vadd.xlane.f32.xlu1 %v2123_v16 }
 0x257   : > { %v673_v18 = vpop.xlane.xlu0 %672 }
 0x258   : > { %1707 = vrcp.f32 %v673_v18 }
 0x25b   : > { %v675_v19 = vpop.xlane.xlu1 %674 }
 0x25c   : > { %1709 = vrcp.f32 %v675_v19  ;;  %v677_v20 = vpop.xlane.xlu0 %676 }
 0x25d   : > { %1711 = vrcp.f32 %v677_v20 }
 0x25f   : > { %v679_v21 = vpop.xlane.xlu1 %678 }
 0x260   : > { %1713 = vrcp.f32 %v679_v21  ;;  %v681_v22 = vpop.xlane.xlu0 %680 }
 0x261   : > { %1715 = vrcp.f32 %v681_v22 }
 0x263   : > { %v683_v23 = vpop.xlane.xlu1 %682 }
 0x264   : > { %1717 = vrcp.f32 %v683_v23  ;;  %v685_v24 = vpop.xlane.xlu0 %684 }
 0x265   : > { %v1708_v25 = vpop.eup %1707  ;;  %1719 = vrcp.f32 %v685_v24 }
 0x266   : > { %v705_v26 = vmul.f32 %v1708_v25, %v2061_v32  ;;  %v910_v32 = vld [vmem:[%s1946_s7 + $0x68] sm:$0xff] }
 0x267   : > { %v687_v27 = vpop.xlane.xlu1 %686 }
 0x268   : > { %1721 = vrcp.f32 %v687_v27  ;;  %v689_v28 = vpop.xlane.xlu0 %688  ;;  %1521 = vmatprep.mubr.f32.mxu1 %v705_v26 }
 0x269   : > { %v1710_v29 = vpop.eup %1709  ;;  %1723 = vrcp.f32 %v689_v28 }
 0x26a   : > { %v1712_v30 = vpop.eup %1711  ;;  %v707_v31 = vmul.f32 %v1710_v29, %v2066_v39 }
 0x26b   : > { %v691_v33 = vpop.xlane.xlu1 %690  ;;  %v709_v34 = vmul.f32 %v1712_v30, %v2068_v40  ;;  %v909_v40 = vld [vmem:[%s1946_s7 + $0x60] sm:$0xff] }
 0x26c   : > { %1725 = vrcp.f32 %v691_v33  ;;  %v693_v36 = vpop.xlane.xlu0 %692  ;;  %1522 = vmatmul.mubr.f32.vlgmr.msra.gmra.mxu1 %v707_v31 }
 0x26d   : > { %v1714_v37 = vpop.eup %1713  ;;  %1727 = vrcp.f32 %v693_v36  ;;  %1524 = vmatprep.mubr.f32.mxu1 %v709_v34  ;;  %1546 = vmatpush3.msra.mxu1 %v912_v17  ;;  %v898_v17 = vld [vmem:[%s1946_s7 + $0x8] sm:$0xff]  ;;  %v882_v34 = vld [vmem:[#allocation2] sm:$0xff]  ;;  %v881_v36 = vld [vmem:[#allocation2 + $0x30] sm:$0xff] }
 0x26e   : > { %v1716_v38 = vpop.eup %1715  ;;  %v711_v41 = vmul.f32 %v1714_v37, %v2074_v47  ;;  %1547 = vmatprep.subr.mxu1 %v911_v35 }
 0x26f   : > { %v695_v42 = vpop.xlane.xlu1 %694  ;;  %v713_v39 = vmul.f32 %v1716_v38, %v2076_v48  ;;  %1548 = vmatpush3.msra.mxu1 %v911_v35  ;;  %v884_v38 = vld [vmem:[#allocation2 + $0x18] sm:$0xff] }
 0x270   : > { %1729 = vrcp.f32 %v695_v42  ;;  %v697_v43 = vpop.xlane.xlu0 %696  ;;  %1525 = vmatmul.mubr.f32.gmra.mxu1 %v711_v41  ;;  %1549 = vmatprep.subr.mxu1 %v910_v32 }
 0x271   : > { %v1718_v44 = vpop.eup %1717  ;;  %1731 = vrcp.f32 %v697_v43  ;;  %1527 = vmatprep.mubr.f32.mxu1 %v713_v39  ;;  %1550 = vmatpush3.msra.mxu1 %v910_v32  ;;  %v883_v39 = vld [vmem:[#allocation2 + $0x58] sm:$0xff] }
 0x272   : > { %v1720_v46 = vpop.eup %1719  ;;  %v715_v47 = vmul.f32 %v1718_v44, %v2084_v57  ;;  %1551 = vmatprep.subr.mxu1 %v909_v40  ;;  %v886_v44 = vld [vmem:[#allocation2 + $0x68] sm:$0xff] }
 0x273   : > { %v699_v49 = vpop.xlane.xlu1 %698  ;;  %v717_v48 = vmul.f32 %v1720_v46, %v2086_v58  ;;  %1552 = vmatpush3.msra.mxu1 %v909_v40  ;;  %v905_v58 = vld [vmem:[%s1946_s7 + $0x40] sm:$0xff] }
 0x274   : > { %1733 = vrcp.f32 %v699_v49  ;;  %v701_v51 = vpop.xlane.xlu0 %700  ;;  %1528 = vmatmul.mubr.f32.gmra.mxu1 %v715_v47  ;;  %1553 = vmatprep.subr.mxu1 %v908_v45  ;;  %v885_v47 = vld [vmem:[#allocation2 + $0x50] sm:$0xff] }
 0x275   : > { %v1722_v52 = vpop.eup %1721  ;;  %1735 = vrcp.f32 %v701_v51  ;;  %1530 = vmatprep.mubr.f32.mxu1 %v717_v48  ;;  %1554 = vmatpush3.msra.mxu1 %v908_v45 }
 0x276   : > { %v1724_v54 = vpop.eup %1723  ;;  %v719_v55 = vmul.f32 %v1722_v52, %v2092_v1  ;;  %1555 = vmatprep.subr.mxu1 %v907_v50  ;;  %v903_v1 = vld [vmem:[%s1946_s7 + $0x30] sm:$0xff] }
 0x277   : > { %v703_v56 = vpop.xlane.xlu1 %702  ;;  %v721_v57 = vmul.f32 %v1724_v54, %v2095_v3  ;;  %1556 = vmatpush3.msra.mxu1 %v907_v50  ;;  %v902_v3 = vld [vmem:[%s1946_s7 + $0x28] sm:$0xff] }
 0x278   : > { %1737 = vrcp.f32 %v703_v56  ;;  %1531 = vmatmul.mubr.f32.gmra.mxu1 %v719_v55  ;;  %1557 = vmatprep.subr.mxu1 %v906_v53  ;;  %v888_v50 = vld [vmem:[#allocation2 + $0x48] sm:$0xff]  ;;  %v890_v56 = vld [vmem:[#allocation2 + $0x20] sm:$0xff] }
 0x279   : > { %v1726_v59 = vpop.eup %1725  ;;  %1533 = vmatprep.mubr.f32.mxu1 %v721_v57  ;;  %1558 = vmatpush3.msra.mxu1 %v906_v53  ;;  %v887_v53 = vld [vmem:[#allocation2 + $0x8] sm:$0xff] }
 0x27a   : > { %v1728_v61 = vpop.eup %1727  ;;  %v723_v62 = vmul.f32 %v1726_v59, %v2100_v5  ;;  %1559 = vmatprep.subr.mxu1 %v905_v58  ;;  %v889_v59 = vld [vmem:[#allocation2 + $0x40] sm:$0xff] }
 0x27b   : > { %v725_v63 = vmul.f32 %v1728_v61, %v2103_v7  ;;  %1560 = vmatpush3.msra.mxu1 %v905_v58 }
 0x27c   : > { %1534 = vmatmul.mubr.f32.gmra.mxu1 %v723_v62  ;;  %1561 = vmatprep.subr.mxu1 %v904_v60  ;;  %v892_v62 = vld [vmem:[#allocation2 + $0x38] sm:$0xff] }
 0x27d   : > { %v1730_v2 = vpop.eup %1729  ;;  %1536 = vmatprep.mubr.f32.mxu1 %v725_v63  ;;  %1562 = vmatpush3.msra.mxu1 %v904_v60 }
 0x27e   : > { %v1732_v4 = vpop.eup %1731  ;;  %v727_v0 = vmul.f32 %v1730_v2, %v2108_v9  ;;  %1563 = vmatprep.subr.mxu1 %v903_v1  ;;  %v891_v2 = vld [vmem:[#allocation2 + $0x10] sm:$0xff] }
 0x27f   : > { %v729_v5 = vmul.f32 %v1732_v4, %v2111_v11  ;;  %1564 = vmatpush3.msra.mxu1 %v903_v1 }
 0x280   : > { %1537 = vmatmul.mubr.f32.gmra.mxu1 %v727_v0  ;;  %1565 = vmatprep.subr.mxu1 %v902_v3  ;;  %v894_v0 = vld [vmem:[#allocation2 + $0x70] sm:$0xff] }
 0x281   : > { %v1734_v7 = vpop.eup %1733  ;;  %1539 = vmatprep.mubr.f32.mxu1 %v729_v5  ;;  %1566 = vmatpush3.msra.mxu1 %v902_v3 }
 0x282   : > { %v1736_v10 = vpop.eup %1735  ;;  %v731_v12 = vmul.f32 %v1734_v7, %v2116_v13  ;;  %1567 = vmatprep.subr.mxu1 %v901_v6  ;;  %v897_v13 = vld [vmem:[%s1946_s7] sm:$0xff] }
 0x283   : > { %v733_v9 = vmul.f32 %v1736_v10, %v2119_v15  ;;  %1568 = vmatpush3.msra.mxu1 %v901_v6  ;;  %v893_v7 = vld [vmem:[#allocation2 + $0x60] sm:$0xff] }
 0x284   : > { %1540 = vmatmul.mubr.f32.gmra.mxu1 %v731_v12  ;;  %1569 = vmatprep.subr.mxu1 %v900_v8  ;;  %v896_v12 = vld [vmem:[#allocation2 + $0x28] sm:$0xff] }
 0x285   : > { %v1738_v11 = vpop.eup %1737  ;;  %1542 = vmatprep.mubr.f32.mxu1 %v733_v9  ;;  %1570 = vmatpush3.msra.mxu1 %v900_v8 }
 0x286   : > { %v735_v18 = vmul.f32 %v1738_v11, %v2123_v16  ;;  %1571 = vmatprep.subr.mxu1 %v899_v14  ;;  %v895_v11 = vld [vmem:[#allocation2 + $0x78] sm:$0xff] }
 0x287   : > { %1572 = vmatpush3.msra.mxu1 %v899_v14 }
 0x288   : > { %1543 = vmatmul.mubr.f32.gmra.mxu1 %v735_v18  ;;  %1573 = vmatprep.subr.mxu1 %v898_v17 }
 0x289   : > { %1574 = vmatpush3.msra.mxu1 %v898_v17 }
 0x28a   : > { %1575 = vmatprep.subr.mxu1 %v897_v13 }
 0x28b   : > { %1576 = vmatpush3.msra.mxu1 %v897_v13 }
 0x32c   : > { %v1523_v19 = vpop.f32.mrf.mxu1 }
 0x32e   : > { %v802_v15 = vpop.f32.mrf.mxu1 }
 0x32f   : > { %1577 = vmatprep.mubr.f32.mxu1 %v802_v15 }
 0x330   : > { %v1526_v20 = vpop.f32.mrf.mxu1  ;;  %1578 = vmatmul.mubr.f32.vlgmr.msra.gmra.mxu1 %v1523_v19 }
 0x332   : > { %v812_v21 = vpop.f32.mrf.mxu1 }
 0x333   : > { %1580 = vmatprep.mubr.f32.mxu1 %v812_v21 }
 0x334   : > { %v1529_v22 = vpop.f32.mrf.mxu1  ;;  %1581 = vmatmul.mubr.f32.gmra.mxu1 %v1526_v20 }
 0x336   : > { %v822_v23 = vpop.f32.mrf.mxu1 }
 0x337   : > { %1583 = vmatprep.mubr.f32.mxu1 %v822_v23 }
 0x338   : > { %v1532_v16 = vpop.f32.mrf.mxu1  ;;  %1584 = vmatmul.mubr.f32.gmra.mxu1 %v1529_v22 }
 0x33a   : > { %v832_v24 = vpop.f32.mrf.mxu1 }
 0x33b   : > { %1586 = vmatprep.mubr.f32.mxu1 %v832_v24 }
 0x33c   : > { %v1535_v25 = vpop.f32.mrf.mxu1  ;;  %1587 = vmatmul.mubr.f32.gmra.mxu1 %v1532_v16 }
 0x33e   : > { %v842_v26 = vpop.f32.mrf.mxu1 }
 0x33f   : > { %1589 = vmatprep.mubr.f32.mxu1 %v842_v26 }
 0x340   : > { %v1538_v27 = vpop.f32.mrf.mxu1  ;;  %1590 = vmatmul.mubr.f32.gmra.mxu1 %v1535_v25 }
 0x342   : > { %v852_v28 = vpop.f32.mrf.mxu1 }
 0x343   : > { %1592 = vmatprep.mubr.f32.mxu1 %v852_v28 }
 0x344   : > { %v1541_v29 = vpop.f32.mrf.mxu1  ;;  %1593 = vmatmul.mubr.f32.gmra.mxu1 %v1538_v27 }
 0x346   : > { %v862_v30 = vpop.f32.mrf.mxu1 }
 0x347   : > { %1595 = vmatprep.mubr.f32.mxu1 %v862_v30 }
 0x348   : > { %v1544_v31 = vpop.f32.mrf.mxu1  ;;  %1596 = vmatmul.mubr.f32.gmra.mxu1 %v1541_v29 }
 0x34a   : > { %v872_v33 = vpop.f32.mrf.mxu1 }
 0x34b   : > { %1598 = vmatprep.mubr.f32.mxu1 %v872_v33 }
 0x34c   : > { %1599 = vmatmul.mubr.f32.gmra.mxu1 %v1544_v31 }
 0x3f0   : > { %v1579_v35 = vpop.f32.mrf.mxu1 }
 0x3f1   : > { %v1059_v37 = vadd.f32 %v1579_v35, %v882_v34 }
 0x3f2   : > { %v979_v32 = vpop.f32.mrf.mxu1 }
 0x3f3   : > { %1075 = vst [vmem:[#allocation2] sm:$0xff] %v1059_v37  ;;  %v1058_v41 = vadd.f32 %v979_v32, %v881_v36 }
 0x3f4   : > { %v1582_v42 = vpop.f32.mrf.mxu1 }
 0x3f5   : > { %1074 = vst [vmem:[#allocation2 + $0x30] sm:$0xff] %v1058_v41  ;;  %v1061_v40 = vadd.f32 %v1582_v42, %v884_v38 }
 0x3f6   : > { %v989_v43 = vpop.f32.mrf.mxu1 }
 0x3f7   : > { %1077 = vst [vmem:[#allocation2 + $0x18] sm:$0xff] %v1061_v40  ;;  %v1060_v45 = vadd.f32 %v989_v43, %v883_v39 }
 0x3f8   : > { %v1585_v46 = vpop.f32.mrf.mxu1 }
 0x3f9   : > { %1076 = vst [vmem:[#allocation2 + $0x58] sm:$0xff] %v1060_v45  ;;  %v1063_v49 = vadd.f32 %v1585_v46, %v886_v44 }
 0x3fa   : > { %v999_v48 = vpop.f32.mrf.mxu1 }
 0x3fb   : > { %1079 = vst [vmem:[#allocation2 + $0x68] sm:$0xff] %v1063_v49  ;;  %v1062_v51 = vadd.f32 %v999_v48, %v885_v47 }
 0x3fc   : > { %v1588_v52 = vpop.f32.mrf.mxu1 }
 0x3fd   : > { %1078 = vst [vmem:[#allocation2 + $0x50] sm:$0xff] %v1062_v51  ;;  %v1065_v54 = vadd.f32 %v1588_v52, %v888_v50 }
 0x3fe   : > { %v1009_v55 = vpop.f32.mrf.mxu1 }
 0x3ff   : > { %1081 = vst [vmem:[#allocation2 + $0x48] sm:$0xff] %v1065_v54  ;;  %v1064_v57 = vadd.f32 %v1009_v55, %v887_v53 }
 0x400   : > { %v1591_v58 = vpop.f32.mrf.mxu1 }
 0x401   : > { %1080 = vst [vmem:[#allocation2 + $0x8] sm:$0xff] %v1064_v57  ;;  %v1067_v60 = vadd.f32 %v1591_v58, %v890_v56 }
 0x402   : > { %v1019_v61 = vpop.f32.mrf.mxu1 }
 0x403   : > { %1083 = vst [vmem:[#allocation2 + $0x20] sm:$0xff] %v1067_v60  ;;  %v1066_v63 = vadd.f32 %v1019_v61, %v889_v59 }
 0x404   : > { %v1594_v1 = vpop.f32.mrf.mxu1 }
 0x405   : > { %1082 = vst [vmem:[#allocation2 + $0x40] sm:$0xff] %v1066_v63  ;;  %v1069_v3 = vadd.f32 %v1594_v1, %v892_v62 }
 0x406   : > { %v1029_v4 = vpop.f32.mrf.mxu1 }
 0x407   : > { %1085 = vst [vmem:[#allocation2 + $0x38] sm:$0xff] %v1069_v3  ;;  %v1068_v5 = vadd.f32 %v1029_v4, %v891_v2 }
 0x408   : > { %v1597_v6 = vpop.f32.mrf.mxu1 }
 0x409   : > { %1084 = vst [vmem:[#allocation2 + $0x10] sm:$0xff] %v1068_v5  ;;  %v1071_v8 = vadd.f32 %v1597_v6, %v894_v0 }
 0x40a   : > { %v1039_v10 = vpop.f32.mrf.mxu1 }
 0x40b   : > { %1087 = vst [vmem:[#allocation2 + $0x70] sm:$0xff] %v1071_v8  ;;  %v1070_v9 = vadd.f32 %v1039_v10, %v893_v7 }
 0x40c   : > { %v1600_v14 = vpop.f32.mrf.mxu1 }
 0x40d   : > { %1086 = vst [vmem:[#allocation2 + $0x60] sm:$0xff] %v1070_v9  ;;  %v1073_v17 = vadd.f32 %v1600_v14, %v896_v12  ;;  %1093 = sbr.rel (%p1328_p1) target bundleno = 1053 (0x41d), region = 48 }
 0x40e   : > { %v1049_v18 = vpop.f32.mrf.mxu1 }
 0x40f   : > { %1089 = vst [vmem:[#allocation2 + $0x28] sm:$0xff] %v1073_v17  ;;  %v1072_v13 = vadd.f32 %v1049_v18, %v895_v11 }
 0x411   : > { %1088 = vst [vmem:[#allocation2 + $0x78] sm:$0xff] %v1072_v13 }
 0x412   : > { %v1094_v19 = vld [vmem:[#allocation2 + $0x30] sm:$0xff]  ;;  %v1329_v15 = vld [vmem:[%s2244_s4] ss:$0 sm:$0xff]  ;;  %v1096_v23 = vld [vmem:[#allocation2 + $0x58] sm:$0xff] }
 0x413   : > { %v1095_v20 = vld [vmem:[#allocation2] sm:$0xff]  ;;  %v1117_v21 = vadd.f32 %v1329_v15, %v1094_v19  ;;  %v1097_v16 = vld [vmem:[#allocation2 + $0x18] sm:$0xff]  ;;  %v1098_v24 = vld [vmem:[#allocation2 + $0x50] sm:$0xff]  ;;  %v1119_v25 = vadd.f32 %v1329_v15, %v1096_v23 }
 0x414   : > { %v1118_v22 = vadd.f32 %v1329_v15, %v1095_v20  ;;  %v1120_v26 = vadd.f32 %v1329_v15, %v1097_v16  ;;  %v1121_v27 = vadd.f32 %v1329_v15, %v1098_v24  ;;  %v1099_v28 = vld [vmem:[#allocation2 + $0x68] sm:$0xff]  ;;  %v1102_v35 = vld [vmem:[#allocation2 + $0x40] sm:$0xff]  ;;  %v1104_v37 = vld [vmem:[#allocation2 + $0x10] sm:$0xff] }
 0x415   : > { %v1100_v29 = vld [vmem:[#allocation2 + $0x8] sm:$0xff]  ;;  %1133 = vst [vmem:[%s1963_s14] sm:$0xff] %v1117_v21  ;;  %v1122_v31 = vadd.f32 %v1329_v15, %v1099_v28  ;;  %v1103_v36 = vld [vmem:[#allocation2 + $0x20] sm:$0xff]  ;;  %1135 = vst [vmem:[%s1963_s14 + $0x10] sm:$0xff] %v1119_v25  ;;  %v1125_v32 = vadd.f32 %v1329_v15, %v1102_v35  ;;  %v1127_v41 = vadd.f32 %v1329_v15, %v1104_v37 }
 0x416   : > { %v1101_v30 = vld [vmem:[#allocation2 + $0x48] sm:$0xff]  ;;  %1134 = vst [vmem:[%s1963_s14 + $0x8] sm:$0xff] %v1118_v22  ;;  %v1123_v33 = vadd.f32 %v1329_v15, %v1100_v29  ;;  %1136 = vst [vmem:[%s1963_s14 + $0x18] sm:$0xff] %v1120_v26  ;;  %v1126_v38 = vadd.f32 %v1329_v15, %v1103_v36  ;;  %v1105_v42 = vld [vmem:[#allocation2 + $0x38] sm:$0xff] }
 0x417   : > { %v1124_v34 = vadd.f32 %v1329_v15, %v1101_v30  ;;  %1137 = vst [vmem:[%s1963_s14 + $0x20] sm:$0xff] %v1121_v27  ;;  %v1106_v39 = vld [vmem:[#allocation2 + $0x60] sm:$0xff]  ;;  %v1107_v40 = vld [vmem:[#allocation2 + $0x70] sm:$0xff]  ;;  %1138 = vst [vmem:[%s1963_s14 + $0x28] sm:$0xff] %v1122_v31  ;;  %v1128_v43 = vadd.f32 %v1329_v15, %v1105_v42 }
 0x418   : > { %1139 = vst [vmem:[%s1963_s14 + $0x30] sm:$0xff] %v1123_v33  ;;  %v1129_v44 = vadd.f32 %v1329_v15, %v1106_v39  ;;  %v1130_v45 = vadd.f32 %v1329_v15, %v1107_v40  ;;  %v1108_v46 = vld [vmem:[#allocation2 + $0x78] sm:$0xff]  ;;  %v1109_v47 = vld [vmem:[#allocation2 + $0x28] sm:$0xff]  ;;  %1141 = vst [vmem:[%s1963_s14 + $0x40] sm:$0xff] %v1125_v32 }
 0x419   : > { %1140 = vst [vmem:[%s1963_s14 + $0x38] sm:$0xff] %v1124_v34  ;;  %1142 = vst [vmem:[%s1963_s14 + $0x48] sm:$0xff] %v1126_v38  ;;  %v1131_v49 = vadd.f32 %v1329_v15, %v1108_v46  ;;  %v1132_v48 = vadd.f32 %v1329_v15, %v1109_v47 }
 0x41a   : > { %1143 = vst [vmem:[%s1963_s14 + $0x50] sm:$0xff] %v1127_v41  ;;  %1144 = vst [vmem:[%s1963_s14 + $0x58] sm:$0xff] %v1128_v43 }
 0x41b   : > { %1145 = vst [vmem:[%s1963_s14 + $0x60] sm:$0xff] %v1129_v44  ;;  %1146 = vst [vmem:[%s1963_s14 + $0x68] sm:$0xff] %v1130_v45 }
 0x41c   : > { %1147 = vst [vmem:[%s1963_s14 + $0x70] sm:$0xff] %v1131_v49  ;;  %1148 = vst [vmem:[%s1963_s14 + $0x78] sm:$0xff] %v1132_v48 }
 0x41d PF: > { %s1336_s21 = sshll.u32 %s1819_s22, 11  ;;  %s1165_s9 = sshll.u32 %s1963_s14, 4  ;;  %s2185_s9 = int_to_ptr.vmem [resolvable:$true] %s1165_s9 }
 0x41e   : > { %s2182_s29 = scalar_lea.hbm %s2245_s5, %s1336_s21  ;;  %s2259_s10 = sand.u32 1, %s1807_s19  }
 0x41f   : > { %s2189_s11 = scalar_lea.sflag [#allocation4], %s2259_s10  ;;  %s1739_s15 = scalar_lea.vmem %s2185_s9, 2048 }
 0x420   : > { %p1740_p2 = scmp.ne.s32.totalorder %s2185_s9, %s1739_s15  ;;  %s1834_s22 = smov [#allocation3]  }
 0x421   : > { %s1743_s16 = sshll.u32 %s1834_s22, 4  ;;  %s1744_s16 = int_to_ptr.vmem [resolvable:$false] %s1743_s16 }
 0x422   : > { %p1741_p4 = pnand %p1740_p2, %p1916_p3  ;;  %s1745_s17 = scalar_lea.vmem %s1744_s16, 4096 }
 0x423   : > { %p1746_p6 = scmp.lt.s32.totalorder %s2185_s9, %s1744_s16  ;;  %p1747_p7 = scmp.lt.s32.totalorder %s1745_s17, %s1739_s15 }
 0x424   : > { %p1742_p5 = pneg %p1741_p4 }
 0x425   : > { %p1748_p8 = por %p1747_p7, %p1746_p6 }
 0x427   : > { %p1749_p10 = pnand %p1748_p8, %p1742_p5 }
 0x429   : > { %1752 = shalt.err (!%p1749_p10)
}
 0x42a   : > { %s1753_s26 = scalar_lea.hbm %s2182_s29, 2048  ;;  %s1757_s8 = scalar_lea.hbm %s2245_s5, 4096 }
 0x42b   : > { %p1754_p11 = scmp.ne.s32.totalorder %s2182_s29, %s1753_s26  ;;  %p1758_p0 = scmp.lt.s32.totalorder %s2182_s29, %s2245_s5 }
 0x42c   : > { %p1759_p1 = scmp.lt.s32.totalorder %s1757_s8, %s1753_s26 }
 0x42d   : > { %p1755_p12 = pnand %p1754_p11, %p1916_p3 }
 0x42e   : > { %p1760_p2 = por %p1759_p1, %p1758_p0 }
 0x42f   : > { %p1756_p13 = pneg %p1755_p12 }
 0x431   : > { %p1761_p4 = pnand %p1760_p2, %p1756_p13 }
 0x433   : > { %1764 = shalt.err (!%p1761_p4)
}
 0x434   : > { %s1835_s14 = smov 128   ;;  %s1836_s20 = smov 8  }
 0x435   : > { %1601 = dma.vmem_to_hbm [thread:$0]  (%p1916_p3), %s2185_s9, 2048, %s2182_s29, %s2189_s11, %s1835_s14, %s1835_s14, %s1836_s20  }
 0x436 PF: > { %p1607_p5 = scmp.ge.s32.totalorder %s1831_s25, 2  ;;  %s1180_s23 = sand.u32 1, %s1803_s18  }
 0x437   : > { %s1181_s21 = scalar_lea.sflag [#allocation4], %s1180_s23 }
 0x438   : > { %p1604_p6 = pnand %p1607_p5, %p1926_p9 }
 0x43a   : > { %p1605_p7 = pneg %p1604_p6 }
 0x43c   : > { %1798 = dma.done.wait (%p1605_p7), %s1181_s21, 2048  }
 0x43d   : > { %1800 = vsyncadd (%p1605_p7), %s1181_s21, 4294965248  ;;  %s18_s25 = sadd.s32 1, %s1831_s25   ;;  %s2260_s24 = sld [smem:[#allocation6_spill]] }
 0x43e   : > { %p15_p8 = scmp.ge.s32.totalorder %s18_s25, 6   ;;  %s2261_s20 = sld [smem:[#allocation11_spill]] }
 0x43f   : > { %s2262_s21 = sld [smem:[#allocation7_spill]]  ;;  %s2266_s18 = smov %s1807_s19 }
 0x440   : > { %s2263_s22 = sld [smem:[#allocation8_spill]] }
 0x441   : > { %s2264_s23 = sld [smem:[#allocation9_spill]] }
 0x442   : > { %s2265_s30 = sld [smem:[#allocation10_spill]] }
 0x443   : > { %s2267_s19 = smov %s2260_s24 }
 0x444   :  { %17 = sbr.rel (!%p15_p8) target bundleno = 5 (0x5), region = 92 }
 0x448   : > { %s2268_s24 = smov %s2265_s30 }
 0x449   :  { %1186 = vsyncpa [#allocation4], 1 }
 0x44a   :  { %1188 = vsyncpa [#allocation4 + $0x1], 1 }

</bundles_post_ra>
